<compile_context>
chip_gen: v5e
topology: v5e:2x2
jax: 0.10.0
libtpu: 0.0.40
codegen_flags: <defaults>
</compile_context>

<pallas_src>
import functools

import jax
import jax.numpy as jnp
from jax.experimental import pallas as pl
from jax.experimental.pallas import tpu as pltpu


def _round_up(x, m):
    return (x + m - 1) // m * m


def _conv_bn_relu_kernel(x_ref, w_ref, bias_ref, o_ref, *,
                         kh, kw, stride, dilation, tile_h, wo, has_relu):
    """Implicit-GEMM conv + folded-BN bias + ReLU for one (batch, row-block)."""
    xv = x_ref.at[0, 0]                      # (h_in, Wp, Cin) VMEM view (no copy)
    rows = tile_h * wo
    nout = o_ref.shape[-1]

    acc = jnp.zeros((rows, nout), jnp.float32)
    for i in range(kh):                      # static unroll over taps (K tiling)
        for j in range(kw):
            h0 = i * dilation
            w0 = j * dilation
            if stride == 1:
                patch = xv[pl.ds(h0, tile_h), pl.ds(w0, wo), :]
            else:
                patch = xv[pl.ds(h0, tile_h, stride), pl.ds(w0, wo, stride), :]
            a2d = patch.reshape(rows, patch.shape[-1])       # (tile_m, Cin)
            acc = acc + jnp.dot(a2d, w_ref[i * kw + j],      # (Cin, Cout_p)
                                preferred_element_type=jnp.float32)

    y = acc + bias_ref[...]                  # f32 bias (BN shift), broadcast (1, Cout_p)
    if has_relu:
        y = jnp.maximum(y, 0.0)
    o_ref[0] = y.astype(o_ref.dtype)


def conv_bn_relu(x, weight, bn_gamma, bn_beta, bn_mean, bn_var, *,
                 stride=1, pad=1, dilation=1, groups=1, bn_eps=1e-5,
                 has_bn=True, has_relu=True, compute_dtype=None,
                 target_block_rows=512, vmem_block_budget=24 * 1024 * 1024):
    """Forward of ConvBnRelu.  x: (N, Cin, H, W), weight: (Cout, Cin, kh, kw)."""
    assert groups == 1  # TODO(synk): grouped conv not implemented.
    N, Cin, H, W = x.shape
    Cout, _, kh, kw = weight.shape
    cdt = jnp.dtype(compute_dtype) if compute_dtype is not None else x.dtype
    # (On v6e/v7x pass compute_dtype=jnp.bfloat16 for the 2x256^2 bf16 MXU path;
    #  accumulation and the BN/ReLU epilogue stay f32 either way.)

    Hp, Wp = H + 2 * pad, W + 2 * pad
    Ho = (Hp - dilation * (kh - 1) - 1) // stride + 1
    Wo = (Wp - dilation * (kw - 1) - 1) // stride + 1
    Cout_p = _round_up(Cout, 128)            # lane-dense output; Cin stays unpadded

    # --- fold BN into weight columns (scale) + epilogue bias (shift) ---
    if has_bn:
        scale = bn_gamma / jnp.sqrt(bn_var + bn_eps)
        shift = bn_beta - bn_mean * scale
    else:
        scale = jnp.ones((Cout,), jnp.float32)
        shift = jnp.zeros((Cout,), jnp.float32)

    # weight: (Cout, Cin, kh, kw) -> per-tap (kh*kw, Cin, Cout), scaled, Cout padded.
    w_taps = weight.transpose(2, 3, 1, 0).reshape(kh * kw, Cin, Cout)
    w_taps = (w_taps.astype(jnp.float32) * scale[None, None, :]).astype(cdt)
    w_p = jnp.zeros((kh * kw, Cin, Cout_p), cdt).at[:, :, :Cout].set(w_taps)
    bias_p = jnp.zeros((1, Cout_p), jnp.float32).at[0, :Cout].set(shift)

    # --- pick the output-row tile so one block is ~target_block_rows GEMM rows ---
    itemsize = jnp.dtype(cdt).itemsize
    tile_h = max(1, min(Ho, max(1, target_block_rows // max(Wo, 1))))

    def vmem_est(th):
        h_in_ = (th - 1) * stride + (kh - 1) * dilation + 1
        return (2 * h_in_ * Wp * max(Cin, 1) * itemsize       # input block (x2 buf)
                + 2 * th * Wo * Cout_p * x.dtype.itemsize     # output block (x2 buf)
                + th * Wo * Cout_p * 4                        # f32 accumulator
                + 2 * kh * kw * Cin * Cout_p * itemsize)      # resident weights

    while tile_h > 1 and vmem_est(tile_h) > vmem_block_budget:
        tile_h = (tile_h + 1) // 2

    num_hb = pl.cdiv(Ho, tile_h)
    h_in = (tile_h - 1) * stride + (kh - 1) * dilation + 1
    rows = tile_h * Wo

    # --- glue: NCHW -> padded NHWC, grouped into overlapping row blocks ---
    # Only the (kh-1)*dilation halo rows are duplicated (vs kh*kw x for im2col).
    xp = jnp.pad(x.transpose(0, 2, 3, 1),
                 ((0, 0), (pad, pad), (pad, pad), (0, 0))).astype(cdt)
    if num_hb == 1 and h_in == Hp:
        xg = xp[:, None]                                       # (N, 1, Hp, Wp, Cin)
    else:
        row_idx = jnp.minimum(
            jnp.arange(num_hb)[:, None] * (tile_h * stride)
            + jnp.arange(h_in)[None, :], Hp - 1)
        xg = xp[:, row_idx]                                    # (N, num_hb, h_in, Wp, Cin)

    kernel = functools.partial(
        _conv_bn_relu_kernel, kh=kh, kw=kw, stride=stride, dilation=dilation,
        tile_h=tile_h, wo=Wo, has_relu=has_relu)

    out = pl.pallas_call(
        kernel,
        out_shape=jax.ShapeDtypeStruct((N * num_hb, rows, Cout_p), x.dtype),
        grid=(N, num_hb),
        in_specs=[
            # activation block: one image, one row-block (+halo), full W and Cin
            pl.BlockSpec((1, 1, h_in, Wp, Cin), lambda n, h: (n, h, 0, 0, 0)),
            # BN-scaled weights, resident (small)
            pl.BlockSpec((kh * kw, Cin, Cout_p), lambda n, h: (0, 0, 0)),
            # f32 bias (BN shift)
            pl.BlockSpec((1, Cout_p), lambda n, h: (0, 0)),
        ],
        out_specs=pl.BlockSpec((1, rows, Cout_p),
                               lambda n, h: (n * num_hb + h, 0, 0)),
        compiler_params=pltpu.CompilerParams(
            dimension_semantics=("parallel", "parallel"),
            vmem_limit_bytes=32 * 1024 * 1024),
    )(xg, w_p, bias_p)

    # --- glue: strip padding, back to NCHW (PyTorch layout) ---
    y = out.reshape(N, num_hb * tile_h, Wo, Cout_p)[:, :Ho, :, :Cout]
    return y.transpose(0, 3, 1, 2)


if __name__ == "__main__":
    # ConvBnRelu(inc=4, outc=8, ksize=3, stride=1, pad=1) on x of shape (2, 4, 16, 16)
    key = jax.random.PRNGKey(0)
    kx, kw_ = jax.random.split(key)

    N, Cin, H, W = 2, 4, 16, 16
    Cout, ksize, stride, pad, dilation = 8, 3, 1, 1, 1
    bn_eps = 1e-5

    x = jax.random.normal(kx, (N, Cin, H, W), dtype=jnp.float32)

    # kaiming_normal_ (fan_in, gain=sqrt(2)) for the conv weight, deterministic.
    fan_in = Cin * ksize * ksize
    weight = jax.random.normal(kw_, (Cout, Cin, ksize, ksize), dtype=jnp.float32) \
             * jnp.sqrt(2.0 / fan_in)

    # BatchNorm2d init: weight=1, bias=0, running_mean=0, running_var=1.
    bn_gamma = jnp.ones((Cout,), jnp.float32)
    bn_beta = jnp.zeros((Cout,), jnp.float32)
    bn_mean = jnp.zeros((Cout,), jnp.float32)
    bn_var = jnp.ones((Cout,), jnp.float32)

    y = conv_bn_relu(x, weight, bn_gamma, bn_beta, bn_mean, bn_var,
                     stride=stride, pad=pad, dilation=dilation, bn_eps=bn_eps,
                     has_bn=True, has_relu=True)
    y = jax.block_until_ready(y)

    # Pure-JAX reference check (conv -> inference BN -> relu), f32.
    ref = jax.lax.conv_general_dilated(
        x, weight, window_strides=(stride, stride),
        padding=((pad, pad), (pad, pad)),
        rhs_dilation=(dilation, dilation),
        dimension_numbers=("NCHW", "OIHW", "NCHW"))
    scale = (bn_gamma / jnp.sqrt(bn_var + bn_eps)).reshape(1, Cout, 1, 1)
    shift = (bn_beta - bn_mean * bn_gamma / jnp.sqrt(bn_var + bn_eps)).reshape(1, Cout, 1, 1)
    ref = jnp.maximum(ref * scale + shift, 0.0)

    assert y.shape == (N, Cout, H, W), y.shape
    assert jnp.allclose(y, ref, atol=1e-4, rtol=1e-4), float(jnp.max(jnp.abs(y - ref)))

    print("KERNEL_OK")
</pallas_src>

<mosaic_0001>
module attributes {stable_mosaic.version = 11 : i64} {
  func.func @_conv_bn_relu_kernel(%arg0: i32, %arg1: i32, %arg2: memref<1x1x18x18x4xf32, #tpu.memory_space<vmem>>, %arg3: memref<9x4x128xf32, #tpu.memory_space<vmem>>, %arg4: memref<1x128xf32, #tpu.memory_space<vmem>>, %arg5: memref<1x256x128xf32, #tpu.memory_space<vmem>>) attributes {dimension_semantics = [#tpu.dimension_semantics<parallel>, #tpu.dimension_semantics<parallel>], iteration_bounds = array<i64: 2, 1>, scalar_prefetch = 0 : i64, scratch_operands = 0 : i64, tpu.core_type = #tpu.core_type<tc>, window_params = [{transform_indices = @transform_0, window_bounds = array<i64: 1, 1, 18, 18, 4>}, {pipeline_mode = #tpu.pipeline_mode<synchronous>, transform_indices = @transform_1, window_bounds = array<i64: 9, 4, 128>}, {pipeline_mode = #tpu.pipeline_mode<synchronous>, transform_indices = @transform_2, window_bounds = array<i64: 1, 128>}, {transform_indices = @transform_3, window_bounds = array<i64: 1, 256, 128>}]} {
    %cst = arith.constant 0.000000e+00 : f32
    %0 = vector.broadcast %cst : f32 to vector<256x128xf32>
    %c0_i32 = arith.constant 0 : i32
    %c0_i32_0 = arith.constant 0 : i32
    %c0_i32_1 = arith.constant 0 : i32
    %c0_i32_2 = arith.constant 0 : i32
    %c0_i32_3 = arith.constant 0 : i32
    %1 = tpu.memref_slice %arg2[%c0_i32, %c0_i32_0, %c0_i32_1, %c0_i32_2, %c0_i32_3] : memref<1x1x18x18x4xf32, #tpu.memory_space<vmem>> -> memref<1x1x18x18x4xf32, #tpu.memory_space<vmem>>
    %2 = tpu.memref_squeeze %1 : memref<1x1x18x18x4xf32, #tpu.memory_space<vmem>> -> memref<18x18x4xf32, #tpu.memory_space<vmem>>
    %c0 = arith.constant 0 : index
    %c0_4 = arith.constant 0 : index
    %c0_5 = arith.constant 0 : index
    %3 = vector.load %2[%c0, %c0_4, %c0_5] : memref<18x18x4xf32, #tpu.memory_space<vmem>>, vector<16x16x4xf32>
    %4 = vector.shape_cast %3 : vector<16x16x4xf32> to vector<256x4xf32>
    %c0_6 = arith.constant 0 : index
    %c0_7 = arith.constant 0 : index
    %c0_8 = arith.constant 0 : index
    %5 = vector.load %arg3[%c0_6, %c0_7, %c0_8] : memref<9x4x128xf32, #tpu.memory_space<vmem>>, vector<1x4x128xf32>
    %6 = vector.shape_cast %5 : vector<1x4x128xf32> to vector<4x128xf32>
    %cst_9 = arith.constant dense<0.000000e+00> : vector<256x128xf32>
    %7 = tpu.matmul %4, %6, %cst_9 {dimension_numbers = #tpu.dot_dimension_numbers<[1], [0], [0], [1], [0, 0, 1, 1], [], []>} : vector<256x4xf32>, vector<4x128xf32>, vector<256x128xf32> -> vector<256x128xf32>
    %8 = arith.addf %0, %7 : vector<256x128xf32>
    %c0_i32_10 = arith.constant 0 : i32
    %c0_i32_11 = arith.constant 0 : i32
    %c0_i32_12 = arith.constant 0 : i32
    %c0_i32_13 = arith.constant 0 : i32
    %c0_i32_14 = arith.constant 0 : i32
    %9 = tpu.memref_slice %arg2[%c0_i32_10, %c0_i32_11, %c0_i32_12, %c0_i32_13, %c0_i32_14] : memref<1x1x18x18x4xf32, #tpu.memory_space<vmem>> -> memref<1x1x18x18x4xf32, #tpu.memory_space<vmem>>
    %10 = tpu.memref_squeeze %9 : memref<1x1x18x18x4xf32, #tpu.memory_space<vmem>> -> memref<18x18x4xf32, #tpu.memory_space<vmem>>
    %c0_15 = arith.constant 0 : index
    %c1 = arith.constant 1 : index
    %c0_16 = arith.constant 0 : index
    %11 = vector.load %10[%c0_15, %c1, %c0_16] : memref<18x18x4xf32, #tpu.memory_space<vmem>>, vector<16x16x4xf32>
    %12 = vector.shape_cast %11 : vector<16x16x4xf32> to vector<256x4xf32>
    %c1_17 = arith.constant 1 : index
    %c0_18 = arith.constant 0 : index
    %c0_19 = arith.constant 0 : index
    %13 = vector.load %arg3[%c1_17, %c0_18, %c0_19] : memref<9x4x128xf32, #tpu.memory_space<vmem>>, vector<1x4x128xf32>
    %14 = vector.shape_cast %13 : vector<1x4x128xf32> to vector<4x128xf32>
    %cst_20 = arith.constant dense<0.000000e+00> : vector<256x128xf32>
    %15 = tpu.matmul %12, %14, %cst_20 {dimension_numbers = #tpu.dot_dimension_numbers<[1], [0], [0], [1], [0, 0, 1, 1], [], []>} : vector<256x4xf32>, vector<4x128xf32>, vector<256x128xf32> -> vector<256x128xf32>
    %16 = arith.addf %8, %15 : vector<256x128xf32>
    %c0_i32_21 = arith.constant 0 : i32
    %c0_i32_22 = arith.constant 0 : i32
    %c0_i32_23 = arith.constant 0 : i32
    %c0_i32_24 = arith.constant 0 : i32
    %c0_i32_25 = arith.constant 0 : i32
    %17 = tpu.memref_slice %arg2[%c0_i32_21, %c0_i32_22, %c0_i32_23, %c0_i32_24, %c0_i32_25] : memref<1x1x18x18x4xf32, #tpu.memory_space<vmem>> -> memref<1x1x18x18x4xf32, #tpu.memory_space<vmem>>
    %18 = tpu.memref_squeeze %17 : memref<1x1x18x18x4xf32, #tpu.memory_space<vmem>> -> memref<18x18x4xf32, #tpu.memory_space<vmem>>
    %c0_26 = arith.constant 0 : index
    %c2 = arith.constant 2 : index
    %c0_27 = arith.constant 0 : index
    %19 = vector.load %18[%c0_26, %c2, %c0_27] : memref<18x18x4xf32, #tpu.memory_space<vmem>>, vector<16x16x4xf32>
    %20 = vector.shape_cast %19 : vector<16x16x4xf32> to vector<256x4xf32>
    %c2_28 = arith.constant 2 : index
    %c0_29 = arith.constant 0 : index
    %c0_30 = arith.constant 0 : index
    %21 = vector.load %arg3[%c2_28, %c0_29, %c0_30] : memref<9x4x128xf32, #tpu.memory_space<vmem>>, vector<1x4x128xf32>
    %22 = vector.shape_cast %21 : vector<1x4x128xf32> to vector<4x128xf32>
    %cst_31 = arith.constant dense<0.000000e+00> : vector<256x128xf32>
    %23 = tpu.matmul %20, %22, %cst_31 {dimension_numbers = #tpu.dot_dimension_numbers<[1], [0], [0], [1], [0, 0, 1, 1], [], []>} : vector<256x4xf32>, vector<4x128xf32>, vector<256x128xf32> -> vector<256x128xf32>
    %24 = arith.addf %16, %23 : vector<256x128xf32>
    %c0_i32_32 = arith.constant 0 : i32
    %c0_i32_33 = arith.constant 0 : i32
    %c0_i32_34 = arith.constant 0 : i32
    %c0_i32_35 = arith.constant 0 : i32
    %c0_i32_36 = arith.constant 0 : i32
    %25 = tpu.memref_slice %arg2[%c0_i32_32, %c0_i32_33, %c0_i32_34, %c0_i32_35, %c0_i32_36] : memref<1x1x18x18x4xf32, #tpu.memory_space<vmem>> -> memref<1x1x18x18x4xf32, #tpu.memory_space<vmem>>
    %26 = tpu.memref_squeeze %25 : memref<1x1x18x18x4xf32, #tpu.memory_space<vmem>> -> memref<18x18x4xf32, #tpu.memory_space<vmem>>
    %c1_37 = arith.constant 1 : index
    %c0_38 = arith.constant 0 : index
    %c0_39 = arith.constant 0 : index
    %27 = vector.load %26[%c1_37, %c0_38, %c0_39] : memref<18x18x4xf32, #tpu.memory_space<vmem>>, vector<16x16x4xf32>
    %28 = vector.shape_cast %27 : vector<16x16x4xf32> to vector<256x4xf32>
    %c3 = arith.constant 3 : index
    %c0_40 = arith.constant 0 : index
    %c0_41 = arith.constant 0 : index
    %29 = vector.load %arg3[%c3, %c0_40, %c0_41] : memref<9x4x128xf32, #tpu.memory_space<vmem>>, vector<1x4x128xf32>
    %30 = vector.shape_cast %29 : vector<1x4x128xf32> to vector<4x128xf32>
    %cst_42 = arith.constant dense<0.000000e+00> : vector<256x128xf32>
    %31 = tpu.matmul %28, %30, %cst_42 {dimension_numbers = #tpu.dot_dimension_numbers<[1], [0], [0], [1], [0, 0, 1, 1], [], []>} : vector<256x4xf32>, vector<4x128xf32>, vector<256x128xf32> -> vector<256x128xf32>
    %32 = arith.addf %24, %31 : vector<256x128xf32>
    %c0_i32_43 = arith.constant 0 : i32
    %c0_i32_44 = arith.constant 0 : i32
    %c0_i32_45 = arith.constant 0 : i32
    %c0_i32_46 = arith.constant 0 : i32
    %c0_i32_47 = arith.constant 0 : i32
    %33 = tpu.memref_slice %arg2[%c0_i32_43, %c0_i32_44, %c0_i32_45, %c0_i32_46, %c0_i32_47] : memref<1x1x18x18x4xf32, #tpu.memory_space<vmem>> -> memref<1x1x18x18x4xf32, #tpu.memory_space<vmem>>
    %34 = tpu.memref_squeeze %33 : memref<1x1x18x18x4xf32, #tpu.memory_space<vmem>> -> memref<18x18x4xf32, #tpu.memory_space<vmem>>
    %c1_48 = arith.constant 1 : index
    %c1_49 = arith.constant 1 : index
    %c0_50 = arith.constant 0 : index
    %35 = vector.load %34[%c1_48, %c1_49, %c0_50] : memref<18x18x4xf32, #tpu.memory_space<vmem>>, vector<16x16x4xf32>
    %36 = vector.shape_cast %35 : vector<16x16x4xf32> to vector<256x4xf32>
    %c4 = arith.constant 4 : index
    %c0_51 = arith.constant 0 : index
    %c0_52 = arith.constant 0 : index
    %37 = vector.load %arg3[%c4, %c0_51, %c0_52] : memref<9x4x128xf32, #tpu.memory_space<vmem>>, vector<1x4x128xf32>
    %38 = vector.shape_cast %37 : vector<1x4x128xf32> to vector<4x128xf32>
    %cst_53 = arith.constant dense<0.000000e+00> : vector<256x128xf32>
    %39 = tpu.matmul %36, %38, %cst_53 {dimension_numbers = #tpu.dot_dimension_numbers<[1], [0], [0], [1], [0, 0, 1, 1], [], []>} : vector<256x4xf32>, vector<4x128xf32>, vector<256x128xf32> -> vector<256x128xf32>
    %40 = arith.addf %32, %39 : vector<256x128xf32>
    %c0_i32_54 = arith.constant 0 : i32
    %c0_i32_55 = arith.constant 0 : i32
    %c0_i32_56 = arith.constant 0 : i32
    %c0_i32_57 = arith.constant 0 : i32
    %c0_i32_58 = arith.constant 0 : i32
    %41 = tpu.memref_slice %arg2[%c0_i32_54, %c0_i32_55, %c0_i32_56, %c0_i32_57, %c0_i32_58] : memref<1x1x18x18x4xf32, #tpu.memory_space<vmem>> -> memref<1x1x18x18x4xf32, #tpu.memory_space<vmem>>
    %42 = tpu.memref_squeeze %41 : memref<1x1x18x18x4xf32, #tpu.memory_space<vmem>> -> memref<18x18x4xf32, #tpu.memory_space<vmem>>
    %c1_59 = arith.constant 1 : index
    %c2_60 = arith.constant 2 : index
    %c0_61 = arith.constant 0 : index
    %43 = vector.load %42[%c1_59, %c2_60, %c0_61] : memref<18x18x4xf32, #tpu.memory_space<vmem>>, vector<16x16x4xf32>
    %44 = vector.shape_cast %43 : vector<16x16x4xf32> to vector<256x4xf32>
    %c5 = arith.constant 5 : index
    %c0_62 = arith.constant 0 : index
    %c0_63 = arith.constant 0 : index
    %45 = vector.load %arg3[%c5, %c0_62, %c0_63] : memref<9x4x128xf32, #tpu.memory_space<vmem>>, vector<1x4x128xf32>
    %46 = vector.shape_cast %45 : vector<1x4x128xf32> to vector<4x128xf32>
    %cst_64 = arith.constant dense<0.000000e+00> : vector<256x128xf32>
    %47 = tpu.matmul %44, %46, %cst_64 {dimension_numbers = #tpu.dot_dimension_numbers<[1], [0], [0], [1], [0, 0, 1, 1], [], []>} : vector<256x4xf32>, vector<4x128xf32>, vector<256x128xf32> -> vector<256x128xf32>
    %48 = arith.addf %40, %47 : vector<256x128xf32>
    %c0_i32_65 = arith.constant 0 : i32
    %c0_i32_66 = arith.constant 0 : i32
    %c0_i32_67 = arith.constant 0 : i32
    %c0_i32_68 = arith.constant 0 : i32
    %c0_i32_69 = arith.constant 0 : i32
    %49 = tpu.memref_slice %arg2[%c0_i32_65, %c0_i32_66, %c0_i32_67, %c0_i32_68, %c0_i32_69] : memref<1x1x18x18x4xf32, #tpu.memory_space<vmem>> -> memref<1x1x18x18x4xf32, #tpu.memory_space<vmem>>
    %50 = tpu.memref_squeeze %49 : memref<1x1x18x18x4xf32, #tpu.memory_space<vmem>> -> memref<18x18x4xf32, #tpu.memory_space<vmem>>
    %c2_70 = arith.constant 2 : index
    %c0_71 = arith.constant 0 : index
    %c0_72 = arith.constant 0 : index
    %51 = vector.load %50[%c2_70, %c0_71, %c0_72] : memref<18x18x4xf32, #tpu.memory_space<vmem>>, vector<16x16x4xf32>
    %52 = vector.shape_cast %51 : vector<16x16x4xf32> to vector<256x4xf32>
    %c6 = arith.constant 6 : index
    %c0_73 = arith.constant 0 : index
    %c0_74 = arith.constant 0 : index
    %53 = vector.load %arg3[%c6, %c0_73, %c0_74] : memref<9x4x128xf32, #tpu.memory_space<vmem>>, vector<1x4x128xf32>
    %54 = vector.shape_cast %53 : vector<1x4x128xf32> to vector<4x128xf32>
    %cst_75 = arith.constant dense<0.000000e+00> : vector<256x128xf32>
    %55 = tpu.matmul %52, %54, %cst_75 {dimension_numbers = #tpu.dot_dimension_numbers<[1], [0], [0], [1], [0, 0, 1, 1], [], []>} : vector<256x4xf32>, vector<4x128xf32>, vector<256x128xf32> -> vector<256x128xf32>
    %56 = arith.addf %48, %55 : vector<256x128xf32>
    %c0_i32_76 = arith.constant 0 : i32
    %c0_i32_77 = arith.constant 0 : i32
    %c0_i32_78 = arith.constant 0 : i32
    %c0_i32_79 = arith.constant 0 : i32
    %c0_i32_80 = arith.constant 0 : i32
    %57 = tpu.memref_slice %arg2[%c0_i32_76, %c0_i32_77, %c0_i32_78, %c0_i32_79, %c0_i32_80] : memref<1x1x18x18x4xf32, #tpu.memory_space<vmem>> -> memref<1x1x18x18x4xf32, #tpu.memory_space<vmem>>
    %58 = tpu.memref_squeeze %57 : memref<1x1x18x18x4xf32, #tpu.memory_space<vmem>> -> memref<18x18x4xf32, #tpu.memory_space<vmem>>
    %c2_81 = arith.constant 2 : index
    %c1_82 = arith.constant 1 : index
    %c0_83 = arith.constant 0 : index
    %59 = vector.load %58[%c2_81, %c1_82, %c0_83] : memref<18x18x4xf32, #tpu.memory_space<vmem>>, vector<16x16x4xf32>
    %60 = vector.shape_cast %59 : vector<16x16x4xf32> to vector<256x4xf32>
    %c7 = arith.constant 7 : index
    %c0_84 = arith.constant 0 : index
    %c0_85 = arith.constant 0 : index
    %61 = vector.load %arg3[%c7, %c0_84, %c0_85] : memref<9x4x128xf32, #tpu.memory_space<vmem>>, vector<1x4x128xf32>
    %62 = vector.shape_cast %61 : vector<1x4x128xf32> to vector<4x128xf32>
    %cst_86 = arith.constant dense<0.000000e+00> : vector<256x128xf32>
    %63 = tpu.matmul %60, %62, %cst_86 {dimension_numbers = #tpu.dot_dimension_numbers<[1], [0], [0], [1], [0, 0, 1, 1], [], []>} : vector<256x4xf32>, vector<4x128xf32>, vector<256x128xf32> -> vector<256x128xf32>
    %64 = arith.addf %56, %63 : vector<256x128xf32>
    %c0_i32_87 = arith.constant 0 : i32
    %c0_i32_88 = arith.constant 0 : i32
    %c0_i32_89 = arith.constant 0 : i32
    %c0_i32_90 = arith.constant 0 : i32
    %c0_i32_91 = arith.constant 0 : i32
    %65 = tpu.memref_slice %arg2[%c0_i32_87, %c0_i32_88, %c0_i32_89, %c0_i32_90, %c0_i32_91] : memref<1x1x18x18x4xf32, #tpu.memory_space<vmem>> -> memref<1x1x18x18x4xf32, #tpu.memory_space<vmem>>
    %66 = tpu.memref_squeeze %65 : memref<1x1x18x18x4xf32, #tpu.memory_space<vmem>> -> memref<18x18x4xf32, #tpu.memory_space<vmem>>
    %c2_92 = arith.constant 2 : index
    %c2_93 = arith.constant 2 : index
    %c0_94 = arith.constant 0 : index
    %67 = vector.load %66[%c2_92, %c2_93, %c0_94] : memref<18x18x4xf32, #tpu.memory_space<vmem>>, vector<16x16x4xf32>
    %68 = vector.shape_cast %67 : vector<16x16x4xf32> to vector<256x4xf32>
    %c8 = arith.constant 8 : index
    %c0_95 = arith.constant 0 : index
    %c0_96 = arith.constant 0 : index
    %69 = vector.load %arg3[%c8, %c0_95, %c0_96] : memref<9x4x128xf32, #tpu.memory_space<vmem>>, vector<1x4x128xf32>
    %70 = vector.shape_cast %69 : vector<1x4x128xf32> to vector<4x128xf32>
    %cst_97 = arith.constant dense<0.000000e+00> : vector<256x128xf32>
    %71 = tpu.matmul %68, %70, %cst_97 {dimension_numbers = #tpu.dot_dimension_numbers<[1], [0], [0], [1], [0, 0, 1, 1], [], []>} : vector<256x4xf32>, vector<4x128xf32>, vector<256x128xf32> -> vector<256x128xf32>
    %72 = arith.addf %64, %71 : vector<256x128xf32>
    %c0_98 = arith.constant 0 : index
    %c0_99 = arith.constant 0 : index
    %73 = vector.load %arg4[%c0_98, %c0_99] : memref<1x128xf32, #tpu.memory_space<vmem>>, vector<1x128xf32>
    %74 = vector.broadcast %73 : vector<1x128xf32> to vector<256x128xf32>
    %75 = arith.addf %72, %74 : vector<256x128xf32>
    %cst_100 = arith.constant 0.000000e+00 : f32
    %76 = vector.broadcast %cst_100 : f32 to vector<256x128xf32>
    %77 = arith.maximumf %75, %76 : vector<256x128xf32>
    %c0_101 = arith.constant 0 : index
    %c0_102 = arith.constant 0 : index
    %c0_103 = arith.constant 0 : index
    %78 = vector.load %arg5[%c0_101, %c0_102, %c0_103] : memref<1x256x128xf32, #tpu.memory_space<vmem>>, vector<1x256x128xf32>
    %79 = vector.shape_cast %78 : vector<1x256x128xf32> to vector<256x128xf32>
    %80 = vector.shape_cast %77 : vector<256x128xf32> to vector<1x256x128xf32>
    tpu.vector_store %arg5[%c0_101, %c0_102, %c0_103], %80 {strides = array<i32>} : memref<1x256x128xf32, #tpu.memory_space<vmem>>, vector<1x256x128xf32>,
    return
  }
  func.func @transform_0(%arg0: i32, %arg1: i32) -> (i32, i32, i32, i32, i32) {
    %c0_i32 = arith.constant 0 : i32
    %c0_i32_0 = arith.constant 0 : i32
    %c0_i32_1 = arith.constant 0 : i32
    %c0_i32_2 = arith.constant 0 : i32
    return %arg0, %arg1, %c0_i32, %c0_i32_0, %c0_i32_1 : i32, i32, i32, i32, i32
  }
  func.func @transform_1(%arg0: i32, %arg1: i32) -> (i32, i32, i32) {
    %c0_i32 = arith.constant 0 : i32
    %c0_i32_0 = arith.constant 0 : i32
    %c0_i32_1 = arith.constant 0 : i32
    %c0_i32_2 = arith.constant 0 : i32
    return %c0_i32, %c0_i32_0, %c0_i32_1 : i32, i32, i32
  }
  func.func @transform_2(%arg0: i32, %arg1: i32) -> (i32, i32) {
    %c0_i32 = arith.constant 0 : i32
    %c0_i32_0 = arith.constant 0 : i32
    %c0_i32_1 = arith.constant 0 : i32
    return %c0_i32, %c0_i32_0 : i32, i32
  }
  func.func @transform_3(%arg0: i32, %arg1: i32) -> (i32, i32, i32) {
    %c1_i32 = arith.constant 1 : i32
    %0 = arith.muli %arg0, %c1_i32 : i32
    %1 = arith.addi %0, %arg1 : i32
    %c0_i32 = arith.constant 0 : i32
    %c0_i32_0 = arith.constant 0 : i32
    %c0_i32_1 = arith.constant 0 : i32
    return %1, %c0_i32, %c0_i32_0 : i32, i32, i32
  }
}

</mosaic_0001>

<bundles_post_ra>
// kernel: tpu_custom_call.1
= control target key start
LH: loop header
LB: loop body
LE: loop exit
PB: predicated region body
PF: predicated region fallthrough
CT: control target
= control target key end

     0   :  { %8 = vsyncpa [#allocation3], 0  ;;  %s4742_s0 = inlined_call_operand.vmem [shape: f32[2,1,18,18,4], index: 0, kind: input, shape index: {}]   ;;  %s4743_s1 = inlined_call_operand.vmem [shape: f32[9,4,128], index: 1, kind: input, shape index: {}]   ;;  %s4744_s2 = inlined_call_operand.vmem [shape: f32[1,128], index: 2, kind: input, shape index: {}]   ;;  %s4745_s3 = inlined_call_operand.hbm [shape: f32[2,256,128], index: 3, kind: output, shape index: {}]  }
   0x1   :  { %10 = vsyncpa [#allocation3 + $0x1], 0  ;;  %s3510_s12 = smov 0   ;;  %s3512_s13 = smov 0  }
   0x2   :  { %s3514_s14 = smov 0   ;;  %s3516_s15 = smov 0  }
   0x3   :  { %s3518_s16 = smov 0   ;;  %s3520_s17 = smov 0  }
   0x4 LB: > { %s2836_s18 = sadd.s32 4294967295, %s3486_s17   ;;  %s2837_s19 = sadd.s32 4294967294, %s3486_s17   ;;  %s3486_s17 = sphi %s3520_s17, %s16_s17   ;;  %s3482_s16 = sphi %s3518_s16, %s4863_s16   ;;  %s3478_s15 = sphi %s3516_s15, %s4862_s15   ;;  %s3474_s14 = sphi %s3514_s14, %s4861_s14   ;;  %s3470_s13 = sphi %s3512_s13, %s4860_s13   ;;  %s3466_s12 = sphi %s3510_s12, %s4859_s12  }
   0x5   : > { %s28_s20 = sadd.s32 1, %s3482_s16  ;;  %s107_s21 = sadd.s32 1, %s3474_s14 }
   0x6   : > { %p30_p0 = scmp.ge.s32.totalorder %s28_s20, 2  ;;  %p117_p1 = scmp.ne.s32.totalorder %s3474_s14, %s3470_s13 }
   0x7   : > { %p118_p2 = scmp.eq.s32.totalorder %s2836_s18, 1  ;;  %p123_p3 = scmp.ne.s32.totalorder %s3470_s13, %s3466_s12 }
   0x8   : > { %s4865_s20 = smov (%p30_p0, %s28_s20), 0  ;;  %p124_p5 = scmp.eq.s32.totalorder %s2837_s19, 1 }
   0x9   : > { %p3550_p4 = por %p118_p2, %p117_p1  ;;  %s104_s23 = ssub.s32 %s3482_s16, %s4865_s20 }
   0xa   : > { %p2840_p6 = scmp.ge.s32.totalorder %s3486_s17, 1  ;;  %p105_p7 = scmp.eq.s32.totalorder %s104_s23, 0 }
   0xb   : > { %p3557_p8 = por %p124_p5, %p123_p3  ;;  %p160_p9 = scmp.lt.s32.totalorder %s3486_s17, 3 }
   0xc   : > { %s3563_s25 = scalar_select %p105_p7, %s3474_s14, %s107_s21  }
   0xd   : > { %p161_p10 = pnand %p2840_p6, %p160_p9 }
   0xf   : > { %164 = sbr.rel (%p161_p10) target bundleno = 743 (0x2e7), region = 32 }
  0x14   : > { %v2843_v0 = vld [vmem:[%s4743_s1 + $0x4] sm:$0xf]  ;;  %vm362_vm0 = vcmask 1043456   ;;  %p188_p11 = scmp.lt.s32.totalorder %s3478_s15, 1  ;;  %v2910_v1 = vld [vmem:[%s4743_s1 + $0x8] sm:$0xf] }
  0x15   : > { %3346 = vmatpush.msk.msra.mxu1 %vm362_vm0, %v2843_v0  ;;  %3347 = vmatpush.msk.msra.mxu2 %vm362_vm0, %v2843_v0  ;;  %v2976_v2 = vld [vmem:[%s4743_s1 + $0xc] sm:$0xf]  ;;  %v230_v3 = vld [vmem:[%s4743_s1] sm:$0xf]  ;;  %v3042_v4 = vld [vmem:[%s4743_s1 + $0x10] sm:$0xf] }
  0x16   : > { %s189_s7 = scalar_select %p188_p11, %s3478_s15, 1  ;;  %3348 = vmatpush.msk.msra.mxu3 %vm362_vm0, %v2843_v0  ;;  %2844 = vmatpush.msk.msra.mxu0 %vm362_vm0, %v2843_v0  ;;  %vm265_vm1 = vcmask 31744   ;;  %v3174_v25 = vld [vmem:[%s4743_s1 + $0x18] sm:$0xf]  ;;  %v3240_v26 = vld [vmem:[%s4743_s1 + $0x1c] sm:$0xf] }
  0x17   : > { %2911 = vmatpush.msk.msrb.mxu2 %vm362_vm0, %v2910_v1  ;;  %2877 = vmatpush.msk.msrb.mxu1 %vm362_vm0, %v230_v3  ;;  %v3108_v27 = vld [vmem:[%s4743_s1 + $0x14] sm:$0xf]  ;;  %v3306_v32 = vld [vmem:[%s4743_s1 + $0x20] sm:$0xf]  ;;  %s185_s5 = sand.u32 1, %s3470_s13   ;;  %s3428_s30 = scalar_lea.hbm %s4745_s3, 512 }
  0x18   : > { %2977 = vmatpush.msk.msrb.mxu3 %vm362_vm0, %v2976_v2  ;;  %s3349_s10 = smul.u32 432, %s189_s7  ;;  %3043 = vmatpush.msk.msrb.mxu0 %vm362_vm0, %v3042_v4  ;;  %s2841_s8 = sshll.u32 %s185_s5, 8 }
  0x19   : > { %s4498_s9 = scalar_lea.vmem [#allocation2], %s2841_s8 }
  0x1a   : > { %s3593_s19 = scalar_lea.vmem %s4742_s0, %s3349_s10  ;;  %s3345_s10 = sshll.u32 %s3478_s15, 8 }
  0x1b   : > { %v3596_v5 = vld [vmem:[%s3593_s19 + $0x61] sm:$0xff]  ;;  %v3613_v9 = vld [vmem:[%s3593_s19 + $0x69] sm:$0xff]  ;;  %v3630_v13 = vld [vmem:[%s3593_s19 + $0x79] sm:$0xff]  ;;  %s2753_s21 = sshll.u32 %s4498_s9, 4  ;;  %s2740_s15 = scalar_lea.sflag [#allocation3], %s185_s5  ;;  %s2754_s21 = int_to_ptr.vmem [resolvable:$true] %s2753_s21 }
  0x1c   : > { %v3599_v6 = vld [vmem:[%s3593_s19 + $0xc1] sm:$0xff]  ;;  %2853 = vmatmul.msk.f32.vlgmr.msra.gmra.mxu1 %vm265_vm1, %v3596_v5  ;;  %v3616_v10 = vld [vmem:[%s3593_s19 + $0xc9] sm:$0xff]  ;;  %v3633_v14 = vld [vmem:[%s3593_s19 + $0xd9] sm:$0xff] }
  0x1d   : > { %v3602_v7 = vld [vmem:[%s3593_s19 + $0x121] sm:$0xff]  ;;  %2861 = vmatmul.msk.f32.vlgmr.msra.gmra.mxu2 %vm265_vm1, %v3599_v6  ;;  %v3619_v11 = vld [vmem:[%s3593_s19 + $0x129] sm:$0xff]  ;;  %v3636_v15 = vld [vmem:[%s3593_s19 + $0x139] sm:$0xff]  ;;  %3109 = vmatpush.msk.msra.mxu1 %vm362_vm0, %v3108_v27 }
  0x1e   : > { %v231_v8 = vld [vmem:[%s3593_s19 + $0x1] sm:$0xff]  ;;  %2869 = vmatmul.msk.f32.vlgmr.msra.gmra.mxu3 %vm265_vm1, %v3602_v7  ;;  %v232_v12 = vld [vmem:[%s3593_s19 + $0x9] sm:$0xff]  ;;  %v233_v16 = vld [vmem:[%s3593_s19 + $0x19] sm:$0xff]  ;;  %3175 = vmatpush.msk.msra.mxu2 %vm362_vm0, %v3174_v25 }
  0x1f   : > { %2845 = vmatmul.msk.f32.vlgmr.msra.gmra.mxu0 %vm265_vm1, %v231_v8  ;;  %v3647_v17 = vld [vmem:[%s3593_s19 + $0x81] sm:$0xff]  ;;  %v3664_v21 = vld [vmem:[%s3593_s19 + $0x91] sm:$0xff]  ;;  %3241 = vmatpush.msk.msra.mxu3 %vm362_vm0, %v3240_v26  ;;  %v3696_v28 = vld [vmem:[%s3593_s19 + $0x99] sm:$0xff] }
  0x20   : > { %v3650_v18 = vld [vmem:[%s3593_s19 + $0xe1] sm:$0xff]  ;;  %v3667_v22 = vld [vmem:[%s3593_s19 + $0xf1] sm:$0xff]  ;;  %v3699_v29 = vld [vmem:[%s3593_s19 + $0xf9] sm:$0xff]  ;;  %3307 = vmatpush.msk.msra.mxu0 %vm362_vm0, %v3306_v32 }
  0x21   : > { %v3653_v19 = vld [vmem:[%s3593_s19 + $0x141] sm:$0xff]  ;;  %v3670_v23 = vld [vmem:[%s3593_s19 + $0x151] sm:$0xff]  ;;  %v3702_v30 = vld [vmem:[%s3593_s19 + $0x159] sm:$0xff] }
  0x22   : > { %v234_v20 = vld [vmem:[%s3593_s19 + $0x21] sm:$0xff]  ;;  %v3673_v24 = vld [vmem:[%s3593_s19 + $0x31] sm:$0xff]  ;;  %v3705_v31 = vld [vmem:[%s3593_s19 + $0x39] sm:$0xff] }
  0x23   : > { %v3720_v33 = vld [vmem:[%s3593_s19 + $0xa9] sm:$0xff]  ;;  %v3740_v37 = vld [vmem:[%s3593_s19 + $0xb1] sm:$0xff]  ;;  %v198_v41 = vld [vmem:[%s3593_s19] sm:$0xff] }
  0x24   : > { %2854 = vmatmul.msk.f32.gmra.mxu1 %vm265_vm1, %v3613_v9  ;;  %v3723_v34 = vld [vmem:[%s3593_s19 + $0x109] sm:$0xff]  ;;  %v3743_v38 = vld [vmem:[%s3593_s19 + $0x111] sm:$0xff]  ;;  %v2945_v46 = vld [vmem:[%s3593_s19 + $0x20] sm:$0xff] }
  0x25   : > { %2862 = vmatmul.msk.f32.gmra.mxu2 %vm265_vm1, %v3616_v10  ;;  %v3726_v35 = vld [vmem:[%s3593_s19 + $0x169] sm:$0xff]  ;;  %v3746_v39 = vld [vmem:[%s3593_s19 + $0x171] sm:$0xff]  ;;  %v3774_v47 = vld [vmem:[%s3593_s19 + $0x1a] sm:$0xff] }
  0x26   : > { %2870 = vmatmul.msk.f32.gmra.mxu3 %vm265_vm1, %v3619_v11  ;;  %v3729_v36 = vld [vmem:[%s3593_s19 + $0x49] sm:$0xff]  ;;  %v3749_v40 = vld [vmem:[%s3593_s19 + $0x51] sm:$0xff]  ;;  %v3814_v53 = vld [vmem:[%s3593_s19 + $0x3a] sm:$0xff] }
  0x27   : > { %2846 = vmatmul.msk.f32.gmra.mxu0 %vm265_vm1, %v232_v12  ;;  %v691_v42 = vld [vmem:[%s3593_s19 + $0x2] sm:$0xff]  ;;  %v2944_v43 = vld [vmem:[%s3593_s19 + $0x18] sm:$0xff]  ;;  %v692_v45 = vld [vmem:[%s3593_s19 + $0xa] sm:$0xff] }
  0x28   : > { %v199_v44 = vld [vmem:[%s3593_s19 + $0x8] sm:$0xff]  ;;  %v3777_v48 = vld [vmem:[%s3593_s19 + $0x30] sm:$0xff]  ;;  %v3790_v50 = vld [vmem:[%s3593_s19 + $0x38] sm:$0xff] }
  0x29   : > { %v3787_v49 = vld [vmem:[%s3593_s19 + $0x22] sm:$0xff]  ;;  %v3800_v51 = vld [vmem:[%s3593_s19 + $0x32] sm:$0xff]  ;;  %v3828_v55 = vld [vmem:[%s3593_s19 + $0x4a] sm:$0xff] }
  0x2a   : > { %v3803_v52 = vld [vmem:[%s3593_s19 + $0x48] sm:$0xff]  ;;  %v3817_v54 = vld [vmem:[%s3593_s19 + $0x50] sm:$0xff]  ;;  %v3831_v56 = vld [vmem:[%s3593_s19 + $0x60] sm:$0xff] }
  0x2b   : > { %v3842_v57 = vld [vmem:[%s3593_s19 + $0x52] sm:$0xff]  ;;  %v3845_v58 = vld [vmem:[%s3593_s19 + $0x68] sm:$0xff]  ;;  %v3883_v3 = vld [vmem:[%s3593_s19 + $0x80] sm:$0xff] }
  0x2c   : > { %2855 = vmatmul.msk.f32.gmra.mxu1 %vm265_vm1, %v3630_v13  ;;  %4773 = vst [vmem:[#allocation5_spill] sm:$0xff] %v3845_v58  ;;  %v3858_v60 = vld [vmem:[%s3593_s19 + $0x62] sm:$0xff]  ;;  %v3861_v61 = vld [vmem:[%s3593_s19 + $0x78] sm:$0xff]  ;;  %v3880_v2 = vld [vmem:[%s3593_s19 + $0x6a] sm:$0xff] }
  0x2d   : > { %2863 = vmatmul.msk.f32.gmra.mxu2 %vm265_vm1, %v3633_v14  ;;  %4774 = vst [vmem:[#allocation6_spill] sm:$0xff] %v3861_v61  ;;  %v3902_v12 = vld [vmem:[%s3593_s19 + $0x7a] sm:$0xff]  ;;  %v3924_v26 = vld [vmem:[%s3593_s19 + $0x82] sm:$0xff] }
  0x2e   : > { %2871 = vmatmul.msk.f32.gmra.mxu3 %vm265_vm1, %v3636_v15  ;;  %4776 = vst [vmem:[#allocation8_spill] sm:$0xff] %v3880_v2  ;;  %v3927_v27 = vld [vmem:[%s3593_s19 + $0x98] sm:$0xff] }
  0x2f   : > { %2847 = vmatmul.msk.f32.gmra.mxu0 %vm265_vm1, %v233_v16  ;;  %4777 = vst [vmem:[#allocation9_spill] sm:$0xff] %v3883_v3 }
  0x30   : > { %4779 = vst [vmem:[#allocation11_spill] sm:$0xff] %v3902_v12 }
  0x31   : > { %4782 = vst [vmem:[#allocation14_spill] sm:$0xff] %v3924_v26 }
  0x32   : > { %4783 = vst [vmem:[#allocation15_spill] sm:$0xff] %v3927_v27 }
  0x34   : > { %2856 = vmatmul.msk.f32.gmra.mxu1 %vm265_vm1, %v3647_v17 }
  0x35   : > { %2864 = vmatmul.msk.f32.gmra.mxu2 %vm265_vm1, %v3650_v18 }
  0x36   : > { %2872 = vmatmul.msk.f32.gmra.mxu3 %vm265_vm1, %v3653_v19 }
  0x37   : > { %2848 = vmatmul.msk.f32.gmra.mxu0 %vm265_vm1, %v234_v20 }
  0x3c   : > { %2857 = vmatmul.msk.f32.gmra.mxu1 %vm265_vm1, %v3664_v21 }
  0x3d   : > { %2865 = vmatmul.msk.f32.gmra.mxu2 %vm265_vm1, %v3667_v22 }
  0x3e   : > { %2873 = vmatmul.msk.f32.gmra.mxu3 %vm265_vm1, %v3670_v23 }
  0x3f   : > { %2849 = vmatmul.msk.f32.gmra.mxu0 %vm265_vm1, %v3673_v24 }
  0x44   : > { %2858 = vmatmul.msk.f32.gmra.mxu1 %vm265_vm1, %v3696_v28 }
  0x45   : > { %2866 = vmatmul.msk.f32.gmra.mxu2 %vm265_vm1, %v3699_v29 }
  0x46   : > { %2874 = vmatmul.msk.f32.gmra.mxu3 %vm265_vm1, %v3702_v30 }
  0x47   : > { %2850 = vmatmul.msk.f32.gmra.mxu0 %vm265_vm1, %v3705_v31 }
  0x4c   : > { %2859 = vmatmul.msk.f32.gmra.mxu1 %vm265_vm1, %v3720_v33 }
  0x4d   : > { %2867 = vmatmul.msk.f32.gmra.mxu2 %vm265_vm1, %v3723_v34 }
  0x4e   : > { %2875 = vmatmul.msk.f32.gmra.mxu3 %vm265_vm1, %v3726_v35 }
  0x4f   : > { %2851 = vmatmul.msk.f32.gmra.mxu0 %vm265_vm1, %v3729_v36 }
  0x54   : > { %2860 = vmatmul.msk.f32.gmra.mxu1 %vm265_vm1, %v3740_v37 }
  0x55   : > { %2868 = vmatmul.msk.f32.gmra.mxu2 %vm265_vm1, %v3743_v38 }
  0x56   : > { %2876 = vmatmul.msk.f32.gmra.mxu3 %vm265_vm1, %v3746_v39 }
  0x57   : > { %2852 = vmatmul.msk.f32.gmra.mxu0 %vm265_vm1, %v3749_v40 }
  0x5c   : > { %2878 = vmatmul.msk.f32.vlgmr.msrb.gmra.mxu1 %vm265_vm1, %v198_v41 }
  0x5d   : > { %2912 = vmatmul.msk.f32.vlgmr.msrb.gmra.mxu2 %vm265_vm1, %v691_v42 }
  0x5e   : > { %2978 = vmatmul.msk.f32.vlgmr.msrb.gmra.mxu3 %vm265_vm1, %v2944_v43 }
  0x5f   : > { %3044 = vmatmul.msk.f32.vlgmr.msrb.gmra.mxu0 %vm265_vm1, %v233_v16 }
  0x64   : > { %2879 = vmatmul.msk.f32.gmra.mxu1 %vm265_vm1, %v199_v44  ;;  %v3949_v44 = vld [vmem:[%s3593_s19 + $0xa8] sm:$0xff] }
  0x65   : > { %2913 = vmatmul.msk.f32.gmra.mxu2 %vm265_vm1, %v692_v45  ;;  %4786 = vst [vmem:[#allocation18_spill] sm:$0xff] %v3949_v44 }
  0x66   : > { %2979 = vmatmul.msk.f32.gmra.mxu3 %vm265_vm1, %v2945_v46 }
  0x67   : > { %3045 = vmatmul.msk.f32.gmra.mxu0 %vm265_vm1, %v234_v20 }
  0x6c   : > { %2880 = vmatmul.msk.f32.gmra.mxu1 %vm265_vm1, %v2944_v43  ;;  %v3946_v43 = vld [vmem:[%s3593_s19 + $0x92] sm:$0xff] }
  0x6d   : > { %2914 = vmatmul.msk.f32.gmra.mxu2 %vm265_vm1, %v3774_v47  ;;  %4785 = vst [vmem:[#allocation17_spill] sm:$0xff] %v3946_v43 }
  0x6e   : > { %2980 = vmatmul.msk.f32.gmra.mxu3 %vm265_vm1, %v3777_v48 }
  0x6f   : > { %3046 = vmatmul.msk.f32.gmra.mxu0 %vm265_vm1, %v3673_v24 }
  0x74   : > { %2881 = vmatmul.msk.f32.gmra.mxu1 %vm265_vm1, %v2945_v46 }
  0x75   : > { %2915 = vmatmul.msk.f32.gmra.mxu2 %vm265_vm1, %v3787_v49 }
  0x76   : > { %2981 = vmatmul.msk.f32.gmra.mxu3 %vm265_vm1, %v3790_v50 }
  0x77   : > { %3047 = vmatmul.msk.f32.gmra.mxu0 %vm265_vm1, %v3705_v31 }
  0x7c   : > { %2882 = vmatmul.msk.f32.gmra.mxu1 %vm265_vm1, %v3777_v48 }
  0x7d   : > { %2916 = vmatmul.msk.f32.gmra.mxu2 %vm265_vm1, %v3800_v51 }
  0x7e   : > { %2982 = vmatmul.msk.f32.gmra.mxu3 %vm265_vm1, %v3803_v52 }
  0x7f   : > { %3048 = vmatmul.msk.f32.gmra.mxu0 %vm265_vm1, %v3729_v36 }
  0x84   : > { %2883 = vmatmul.msk.f32.gmra.mxu1 %vm265_vm1, %v3790_v50 }
  0x85   : > { %2917 = vmatmul.msk.f32.gmra.mxu2 %vm265_vm1, %v3814_v53 }
  0x86   : > { %2983 = vmatmul.msk.f32.gmra.mxu3 %vm265_vm1, %v3817_v54 }
  0x87   : > { %3049 = vmatmul.msk.f32.gmra.mxu0 %vm265_vm1, %v3749_v40 }
  0x8c   : > { %2884 = vmatmul.msk.f32.gmra.mxu1 %vm265_vm1, %v3803_v52 }
  0x8d   : > { %2918 = vmatmul.msk.f32.gmra.mxu2 %vm265_vm1, %v3828_v55 }
  0x8e   : > { %2984 = vmatmul.msk.f32.gmra.mxu3 %vm265_vm1, %v3831_v56 }
  0x8f   : > { %3050 = vmatmul.msk.f32.gmra.mxu0 %vm265_vm1, %v3596_v5 }
  0x94   : > { %2885 = vmatmul.msk.f32.gmra.mxu1 %vm265_vm1, %v3817_v54 }
  0x95   : > { %2919 = vmatmul.msk.f32.gmra.mxu2 %vm265_vm1, %v3842_v57 }
  0x96   : > { %2985 = vmatmul.msk.f32.gmra.mxu3 %vm265_vm1, %v3845_v58 }
  0x97   : > { %3051 = vmatmul.msk.f32.gmra.mxu0 %vm265_vm1, %v3613_v9 }
  0x99   : > { %v3855_v59 = vpop.f32.mrf.mxu1 }
  0x9c   : > { %v3863_v62 = vpop.f32.mrf.mxu0  ;;  %2886 = vmatmul.msk.f32.gmra.mxu1 %vm265_vm1, %v3831_v56 }
  0x9d   : > { %2920 = vmatmul.msk.f32.gmra.mxu2 %vm265_vm1, %v3858_v60 }
  0x9e   : > { %2986 = vmatmul.msk.f32.gmra.mxu3 %vm265_vm1, %v3861_v61 }
  0x9f   : > { %3052 = vmatmul.msk.f32.gmra.mxu0 %vm265_vm1, %v3630_v13  ;;  %v3905_v13 = vld [vmem:[%s3593_s19 + $0x90] sm:$0xff] }
  0xa0   : > { %v3873_v63 = vpop.f32.mrf.mxu2  ;;  %4780 = vst [vmem:[#allocation12_spill] sm:$0xff] %v3905_v13 }
  0xa1   : > { %v3875_v0 = vpop.f32.mrf.mxu3  ;;  %v3877_v1 = vpop.f32.mrf.mxu1 }
  0xa2   : > { %4775 = vst [vmem:[#allocation7_spill] sm:$0xff] %v3875_v0 }
  0xa4   : > { %v3885_v4 = vpop.f32.mrf.mxu0  ;;  %2887 = vmatmul.msk.f32.gmra.mxu1 %vm265_vm1, %v3845_v58  ;;  %v4050_v58 = vld [vmem:[%s3593_s19 + $0xe0] sm:$0xff] }
  0xa5   : > { %2921 = vmatmul.msk.f32.gmra.mxu2 %vm265_vm1, %v3880_v2  ;;  %v4047_v2 = vld [vmem:[%s3593_s19 + $0xca] sm:$0xff] }
  0xa6   : > { %2987 = vmatmul.msk.f32.gmra.mxu3 %vm265_vm1, %v3883_v3 }
  0xa7   : > { %3053 = vmatmul.msk.f32.gmra.mxu0 %vm265_vm1, %v3647_v17 }
  0xa8   : > { %v3895_v5 = vpop.f32.mrf.mxu2 }
  0xa9   : > { %v3897_v8 = vpop.f32.mrf.mxu3  ;;  %v3899_v9 = vpop.f32.mrf.mxu1 }
  0xaa   : > { %4778 = vst [vmem:[#allocation10_spill] sm:$0xff] %v3897_v8  ;;  %v3971_v8 = vld [vmem:[%s3593_s19 + $0xb0] sm:$0xff] }
  0xab   : > { %4790 = vst [vmem:[#allocation22_spill] sm:$0xff] %v3971_v8 }
  0xac   : > { %v3907_v16 = vpop.f32.mrf.mxu0  ;;  %2888 = vmatmul.msk.f32.gmra.mxu1 %vm265_vm1, %v3861_v61  ;;  %v4035_v61 = vld [vmem:[%s3593_s19 + $0xd8] sm:$0xff] }
  0xad   : > { %2922 = vmatmul.msk.f32.gmra.mxu2 %vm265_vm1, %v3902_v12 }
  0xae   : > { %2988 = vmatmul.msk.f32.gmra.mxu3 %vm265_vm1, %v3905_v13 }
  0xaf   : > { %3054 = vmatmul.msk.f32.gmra.mxu0 %vm265_vm1, %v3664_v21 }
  0xb0   : > { %v3917_v17 = vpop.f32.mrf.mxu2 }
  0xb1   : > { %v3919_v20 = vpop.f32.mrf.mxu3  ;;  %v3921_v25 = vpop.f32.mrf.mxu1 }
  0xb2   : > { %4781 = vst [vmem:[#allocation13_spill] sm:$0xff] %v3919_v20  ;;  %v3968_v20 = vld [vmem:[%s3593_s19 + $0x9a] sm:$0xff] }
  0xb3   : > { %4789 = vst [vmem:[#allocation21_spill] sm:$0xff] %v3968_v20 }
  0xb4   : > { %v3929_v32 = vpop.f32.mrf.mxu0  ;;  %2889 = vmatmul.msk.f32.gmra.mxu1 %vm265_vm1, %v3883_v3  ;;  %v4012_v3 = vld [vmem:[%s3593_s19 + $0xb2] sm:$0xff] }
  0xb5   : > { %2923 = vmatmul.msk.f32.gmra.mxu2 %vm265_vm1, %v3924_v26  ;;  %4797 = vst [vmem:[#allocation29_spill] sm:$0xff] %v4012_v3 }
  0xb6   : > { %2989 = vmatmul.msk.f32.gmra.mxu3 %vm265_vm1, %v3927_v27 }
  0xb7   : > { %3055 = vmatmul.msk.f32.gmra.mxu0 %vm265_vm1, %v3696_v28 }
  0xb8   : > { %v3939_v21 = vpop.f32.mrf.mxu2 }
  0xb9   : > { %v3941_v41 = vpop.f32.mrf.mxu3  ;;  %v3943_v42 = vpop.f32.mrf.mxu1 }
  0xba   : > { %4784 = vst [vmem:[#allocation16_spill] sm:$0xff] %v3941_v41 }
  0xbc   : > { %v3951_v45 = vpop.f32.mrf.mxu0  ;;  %2890 = vmatmul.msk.f32.gmra.mxu1 %vm265_vm1, %v3905_v13  ;;  %v3990_v13 = vld [vmem:[%s3593_s19 + $0xaa] sm:$0xff] }
  0xbd   : > { %2924 = vmatmul.msk.f32.gmra.mxu2 %vm265_vm1, %v3946_v43  ;;  %4793 = vst [vmem:[#allocation25_spill] sm:$0xff] %v3990_v13 }
  0xbe   : > { %2990 = vmatmul.msk.f32.gmra.mxu3 %vm265_vm1, %v3949_v44 }
  0xbf   : > { %3056 = vmatmul.msk.f32.gmra.mxu0 %vm265_vm1, %v3720_v33 }
  0xc0   : > { %v3961_v28 = vpop.f32.mrf.mxu2 }
  0xc1   : > { %4787 = vst [vmem:[#allocation19_spill] sm:$0xff] %v3961_v28  ;;  %v3963_v46 = vpop.f32.mrf.mxu3  ;;  %v3965_v41 = vpop.f32.mrf.mxu1 }
  0xc2   : > { %4788 = vst [vmem:[#allocation20_spill] sm:$0xff] %v3963_v46 }
  0xc4   : > { %v3973_v0 = vpop.f32.mrf.mxu0  ;;  %2891 = vmatmul.msk.f32.gmra.mxu1 %vm265_vm1, %v3927_v27  ;;  %v3993_v27 = vld [vmem:[%s3593_s19 + $0xc0] sm:$0xff] }
  0xc5   : > { %2925 = vmatmul.msk.f32.gmra.mxu2 %vm265_vm1, %v3968_v20  ;;  %4794 = vst [vmem:[#allocation26_spill] sm:$0xff] %v3993_v27 }
  0xc6   : > { %2991 = vmatmul.msk.f32.gmra.mxu3 %vm265_vm1, %v3971_v8 }
  0xc7   : > { %3057 = vmatmul.msk.f32.gmra.mxu0 %vm265_vm1, %v3740_v37 }
  0xc8   : > { %v3983_v33 = vpop.f32.mrf.mxu2 }
  0xc9   : > { %4791 = vst [vmem:[#allocation23_spill] sm:$0xff] %v3983_v33  ;;  %v3985_v46 = vpop.f32.mrf.mxu3  ;;  %v3987_v43 = vpop.f32.mrf.mxu1 }
  0xca   : > { %4792 = vst [vmem:[#allocation24_spill] sm:$0xff] %v3985_v46 }
  0xcc   : > { %v3995_v26 = vpop.f32.mrf.mxu0  ;;  %2892 = vmatmul.msk.f32.gmra.mxu1 %vm265_vm1, %v3949_v44  ;;  %v4015_v44 = vld [vmem:[%s3593_s19 + $0xc8] sm:$0xff] }
  0xcd   : > { %2926 = vmatmul.msk.f32.gmra.mxu2 %vm265_vm1, %v3990_v13 }
  0xce   : > { %2992 = vmatmul.msk.f32.gmra.mxu3 %vm265_vm1, %v3993_v27 }
  0xcf   : > { %3058 = vmatmul.msk.f32.gmra.mxu0 %vm265_vm1, %v3599_v6 }
  0xd0   : > { %v4005_v37 = vpop.f32.mrf.mxu2 }
  0xd1   : > { %4795 = vst [vmem:[#allocation27_spill] sm:$0xff] %v4005_v37  ;;  %v4007_v46 = vpop.f32.mrf.mxu3  ;;  %v4009_v20 = vpop.f32.mrf.mxu1  ;;  %v4032_v37 = vld [vmem:[%s3593_s19 + $0xc2] sm:$0xff] }
  0xd2   : > { %4796 = vst [vmem:[#allocation28_spill] sm:$0xff] %v4007_v46 }
  0xd3   : > { %4800 = vst [vmem:[#allocation32_spill] sm:$0xff] %v4032_v37 }
  0xd4   : > { %v4017_v12 = vpop.f32.mrf.mxu0  ;;  %2893 = vmatmul.msk.f32.gmra.mxu1 %vm265_vm1, %v3971_v8 }
  0xd5   : > { %2927 = vmatmul.msk.f32.gmra.mxu2 %vm265_vm1, %v4012_v3 }
  0xd6   : > { %2993 = vmatmul.msk.f32.gmra.mxu3 %vm265_vm1, %v4015_v44 }
  0xd7   : > { %3059 = vmatmul.msk.f32.gmra.mxu0 %vm265_vm1, %v3616_v10 }
  0xd8   : > { %v4027_v6 = vpop.f32.mrf.mxu2 }
  0xd9   : > { %4798 = vst [vmem:[#allocation30_spill] sm:$0xff] %v4027_v6  ;;  %v4029_v46 = vpop.f32.mrf.mxu3  ;;  %v595_v13 = vpop.f32.mrf.mxu1 }
  0xda   : > { %4799 = vst [vmem:[#allocation31_spill] sm:$0xff] %v4029_v46  ;;  %v596_v10 = vadd.f32 %v595_v13, %v3863_v62 }
  0xdc   : > { %v1398_v8 = vpop.f32.mrf.mxu0  ;;  %2894 = vmatmul.msk.f32.gmra.mxu1 %vm265_vm1, %v3993_v27 }
  0xdd   : > { %2928 = vmatmul.msk.f32.gmra.mxu2 %vm265_vm1, %v4032_v37 }
  0xde   : > { %2994 = vmatmul.msk.f32.gmra.mxu3 %vm265_vm1, %v4035_v61 }
  0xdf   : > { %3060 = vmatmul.msk.f32.gmra.mxu0 %vm265_vm1, %v3633_v14 }
  0xe0   : > { %v841_v46 = vpop.f32.mrf.mxu2 }
  0xe1   : > { %v937_v3 = vadd.f32 %v841_v46, %v596_v10  ;;  %v1120_v6 = vpop.f32.mrf.mxu3  ;;  %v598_v33 = vpop.f32.mrf.mxu1 }
  0xe2   : > { %v599_v14 = vadd.f32 %v598_v33, %v3885_v4 }
  0xe3   : > { %v1216_v27 = vadd.f32 %v1120_v6, %v937_v3  ;;  %v4067_v6 = vld [vmem:[%s3593_s19 + $0xf0] sm:$0xff] }
  0xe4   : > { %v1401_v37 = vpop.f32.mrf.mxu0  ;;  %2895 = vmatmul.msk.f32.gmra.mxu1 %vm265_vm1, %v4015_v44 }
  0xe5   : > { %v4052_v28 = vadd.f32 %v1398_v8, %v1216_v27  ;;  %2929 = vmatmul.msk.f32.gmra.mxu2 %vm265_vm1, %v4047_v2  ;;  %v4064_v27 = vld [vmem:[%s3593_s19 + $0xda] sm:$0xff] }
  0xe6   : > { %2995 = vmatmul.msk.f32.gmra.mxu3 %vm265_vm1, %v4050_v58 }
  0xe7   : > { %4801 = vst [vmem:[#allocation33_spill] sm:$0xff] %v4052_v28  ;;  %3061 = vmatmul.msk.f32.gmra.mxu0 %vm265_vm1, %v3650_v18 }
  0xe8   : > { %v844_v62 = vpop.f32.mrf.mxu2 }
  0xe9   : > { %v938_v3 = vadd.f32 %v844_v62, %v599_v14  ;;  %v1123_v13 = vpop.f32.mrf.mxu3  ;;  %v601_v8 = vpop.f32.mrf.mxu1  ;;  %v4081_v62 = vld [vmem:[%s3593_s19 + $0xe2] sm:$0xff] }
  0xea   : > { %v602_v18 = vadd.f32 %v601_v8, %v3907_v16 }
  0xeb   : > { %v1217_v46 = vadd.f32 %v1123_v13, %v938_v3  ;;  %v4084_v13 = vld [vmem:[%s3593_s19 + $0xf8] sm:$0xff] }
  0xec   : > { %v1404_v10 = vpop.f32.mrf.mxu0  ;;  %2896 = vmatmul.msk.f32.gmra.mxu1 %vm265_vm1, %v4035_v61 }
  0xed   : > { %v4069_v28 = vadd.f32 %v1401_v37, %v1217_v46  ;;  %2930 = vmatmul.msk.f32.gmra.mxu2 %vm265_vm1, %v4064_v27 }
  0xee   : > { %2996 = vmatmul.msk.f32.gmra.mxu3 %vm265_vm1, %v4067_v6 }
  0xef   : > { %4802 = vst [vmem:[#allocation34_spill] sm:$0xff] %v4069_v28  ;;  %3062 = vmatmul.msk.f32.gmra.mxu0 %vm265_vm1, %v3667_v22 }
  0xf0   : > { %v847_v4 = vpop.f32.mrf.mxu2 }
  0xf1   : > { %v939_v33 = vadd.f32 %v847_v4, %v602_v18  ;;  %v1126_v14 = vpop.f32.mrf.mxu3  ;;  %v604_v37 = vpop.f32.mrf.mxu1  ;;  %v4098_v4 = vld [vmem:[%s3593_s19 + $0xf2] sm:$0xff] }
  0xf2   : > { %v605_v22 = vadd.f32 %v604_v37, %v3929_v32 }
  0xf3   : > { %v1218_v3 = vadd.f32 %v1126_v14, %v939_v33  ;;  %v4101_v14 = vld [vmem:[%s3593_s19 + $0x108] sm:$0xff] }
  0xf4   : > { %v1407_v46 = vpop.f32.mrf.mxu0  ;;  %2897 = vmatmul.msk.f32.gmra.mxu1 %vm265_vm1, %v4050_v58 }
  0xf5   : > { %v4086_v28 = vadd.f32 %v1404_v10, %v1218_v3  ;;  %2931 = vmatmul.msk.f32.gmra.mxu2 %vm265_vm1, %v4081_v62 }
  0xf6   : > { %2997 = vmatmul.msk.f32.gmra.mxu3 %vm265_vm1, %v4084_v13 }
  0xf7   : > { %4803 = vst [vmem:[#allocation35_spill] sm:$0xff] %v4086_v28  ;;  %3063 = vmatmul.msk.f32.gmra.mxu0 %vm265_vm1, %v3699_v29 }
  0xf8   : > { %v850_v16 = vpop.f32.mrf.mxu2 }
  0xf9   : > { %v940_v8 = vadd.f32 %v850_v16, %v605_v22  ;;  %v1129_v18 = vpop.f32.mrf.mxu3  ;;  %v607_v10 = vpop.f32.mrf.mxu1  ;;  %v4115_v16 = vld [vmem:[%s3593_s19 + $0xfa] sm:$0xff] }
  0xfa   : > { %v608_v29 = vadd.f32 %v607_v10, %v3951_v45 }
  0xfb   : > { %v1219_v33 = vadd.f32 %v1129_v18, %v940_v8  ;;  %v4118_v18 = vld [vmem:[%s3593_s19 + $0x110] sm:$0xff] }
  0xfc   : > { %v1410_v3 = vpop.f32.mrf.mxu0  ;;  %2898 = vmatmul.msk.f32.gmra.mxu1 %vm265_vm1, %v4067_v6 }
  0xfd   : > { %v4103_v28 = vadd.f32 %v1407_v46, %v1219_v33  ;;  %2932 = vmatmul.msk.f32.gmra.mxu2 %vm265_vm1, %v4098_v4 }
  0xfe   : > { %2998 = vmatmul.msk.f32.gmra.mxu3 %vm265_vm1, %v4101_v14 }
  0xff   : > { %4804 = vst [vmem:[#allocation36_spill] sm:$0xff] %v4103_v28  ;;  %3064 = vmatmul.msk.f32.gmra.mxu0 %vm265_vm1, %v3723_v34 }
 0x100   : > { %v853_v32 = vpop.f32.mrf.mxu2 }
 0x101   : > { %v941_v37 = vadd.f32 %v853_v32, %v608_v29  ;;  %v1132_v22 = vpop.f32.mrf.mxu3  ;;  %v610_v46 = vpop.f32.mrf.mxu1  ;;  %v4132_v32 = vld [vmem:[%s3593_s19 + $0x10a] sm:$0xff] }
 0x102   : > { %v611_v34 = vadd.f32 %v610_v46, %v3973_v0 }
 0x103   : > { %v1220_v8 = vadd.f32 %v1132_v22, %v941_v37  ;;  %v4135_v22 = vld [vmem:[%s3593_s19 + $0x120] sm:$0xff] }
 0x104   : > { %v1413_v33 = vpop.f32.mrf.mxu0  ;;  %2899 = vmatmul.msk.f32.gmra.mxu1 %vm265_vm1, %v4084_v13 }
 0x105   : > { %v4120_v28 = vadd.f32 %v1410_v3, %v1220_v8  ;;  %2933 = vmatmul.msk.f32.gmra.mxu2 %vm265_vm1, %v4115_v16 }
 0x106   : > { %2999 = vmatmul.msk.f32.gmra.mxu3 %vm265_vm1, %v4118_v18 }
 0x107   : > { %4805 = vst [vmem:[#allocation37_spill] sm:$0xff] %v4120_v28  ;;  %3065 = vmatmul.msk.f32.gmra.mxu0 %vm265_vm1, %v3743_v38 }
 0x108   : > { %v856_v45 = vpop.f32.mrf.mxu2 }
 0x109   : > { %v942_v10 = vadd.f32 %v856_v45, %v611_v34  ;;  %v1135_v29 = vpop.f32.mrf.mxu3  ;;  %v613_v3 = vpop.f32.mrf.mxu1  ;;  %v4149_v45 = vld [vmem:[%s3593_s19 + $0x112] sm:$0xff] }
 0x10a   : > { %v614_v38 = vadd.f32 %v613_v3, %v3995_v26 }
 0x10b   : > { %v1221_v37 = vadd.f32 %v1135_v29, %v942_v10  ;;  %v4152_v29 = vld [vmem:[%s3593_s19 + $0x128] sm:$0xff] }
 0x10c   : > { %v1416_v8 = vpop.f32.mrf.mxu0  ;;  %2900 = vmatmul.msk.f32.gmra.mxu1 %vm265_vm1, %v4101_v14 }
 0x10d   : > { %v4137_v28 = vadd.f32 %v1413_v33, %v1221_v37  ;;  %2934 = vmatmul.msk.f32.gmra.mxu2 %vm265_vm1, %v4132_v32 }
 0x10e   : > { %3000 = vmatmul.msk.f32.gmra.mxu3 %vm265_vm1, %v4135_v22 }
 0x10f   : > { %4806 = vst [vmem:[#allocation38_spill] sm:$0xff] %v4137_v28  ;;  %3066 = vmatmul.msk.f32.gmra.mxu0 %vm265_vm1, %v3602_v7 }
 0x110   : > { %v859_v0 = vpop.f32.mrf.mxu2 }
 0x111   : > { %v943_v46 = vadd.f32 %v859_v0, %v614_v38  ;;  %v1138_v34 = vpop.f32.mrf.mxu3  ;;  %v616_v33 = vpop.f32.mrf.mxu1  ;;  %v4166_v0 = vld [vmem:[%s3593_s19 + $0x122] sm:$0xff] }
 0x112   : > { %v617_v7 = vadd.f32 %v616_v33, %v4017_v12 }
 0x113   : > { %v1222_v10 = vadd.f32 %v1138_v34, %v943_v46  ;;  %v4169_v34 = vld [vmem:[%s3593_s19 + $0x138] sm:$0xff] }
 0x114   : > { %v1419_v37 = vpop.f32.mrf.mxu0  ;;  %2901 = vmatmul.msk.f32.gmra.mxu1 %vm265_vm1, %v4118_v18 }
 0x115   : > { %v4154_v28 = vadd.f32 %v1416_v8, %v1222_v10  ;;  %2935 = vmatmul.msk.f32.gmra.mxu2 %vm265_vm1, %v4149_v45 }
 0x116   : > { %3001 = vmatmul.msk.f32.gmra.mxu3 %vm265_vm1, %v4152_v29 }
 0x117   : > { %4807 = vst [vmem:[#allocation39_spill] sm:$0xff] %v4154_v28  ;;  %3067 = vmatmul.msk.f32.gmra.mxu0 %vm265_vm1, %v3619_v11 }
 0x118   : > { %v862_v26 = vpop.f32.mrf.mxu2 }
 0x119   : > { %v944_v3 = vadd.f32 %v862_v26, %v617_v7  ;;  %v1141_v38 = vpop.f32.mrf.mxu3  ;;  %v619_v8 = vpop.f32.mrf.mxu1  ;;  %v4183_v26 = vld [vmem:[%s3593_s19 + $0x12a] sm:$0xff] }
 0x11a   : > { %v620_v11 = vadd.f32 %v619_v8, %v3855_v59 }
 0x11b   : > { %v1223_v46 = vadd.f32 %v1141_v38, %v944_v3  ;;  %v4186_v38 = vld [vmem:[%s3593_s19 + $0x140] sm:$0xff] }
 0x11c   : > { %v1422_v10 = vpop.f32.mrf.mxu0  ;;  %2902 = vmatmul.msk.f32.gmra.mxu1 %vm265_vm1, %v4135_v22 }
 0x11d   : > { %v4171_v28 = vadd.f32 %v1419_v37, %v1223_v46  ;;  %2936 = vmatmul.msk.f32.gmra.mxu2 %vm265_vm1, %v4166_v0 }
 0x11e   : > { %3002 = vmatmul.msk.f32.gmra.mxu3 %vm265_vm1, %v4169_v34 }
 0x11f   : > { %4808 = vst [vmem:[#allocation40_spill] sm:$0xff] %v4171_v28  ;;  %3068 = vmatmul.msk.f32.gmra.mxu0 %vm265_vm1, %v3636_v15 }
 0x120   : > { %v865_v12 = vpop.f32.mrf.mxu2 }
 0x121   : > { %v945_v33 = vadd.f32 %v865_v12, %v620_v11  ;;  %v1144_v7 = vpop.f32.mrf.mxu3  ;;  %v622_v37 = vpop.f32.mrf.mxu1  ;;  %v4200_v12 = vld [vmem:[%s3593_s19 + $0x13a] sm:$0xff] }
 0x122   : > { %v623_v15 = vadd.f32 %v622_v37, %v3877_v1 }
 0x123   : > { %v1224_v3 = vadd.f32 %v1144_v7, %v945_v33  ;;  %v4203_v7 = vld [vmem:[%s3593_s19 + $0x150] sm:$0xff] }
 0x124   : > { %v1425_v46 = vpop.f32.mrf.mxu0  ;;  %2903 = vmatmul.msk.f32.gmra.mxu1 %vm265_vm1, %v4152_v29 }
 0x125   : > { %v4188_v28 = vadd.f32 %v1422_v10, %v1224_v3  ;;  %2937 = vmatmul.msk.f32.gmra.mxu2 %vm265_vm1, %v4183_v26 }
 0x126   : > { %3003 = vmatmul.msk.f32.gmra.mxu3 %vm265_vm1, %v4186_v38 }
 0x127   : > { %4809 = vst [vmem:[#allocation41_spill] sm:$0xff] %v4188_v28  ;;  %3069 = vmatmul.msk.f32.gmra.mxu0 %vm265_vm1, %v3653_v19 }
 0x128   : > { %v868_v59 = vpop.f32.mrf.mxu2 }
 0x129   : > { %v946_v8 = vadd.f32 %v868_v59, %v623_v15  ;;  %v1147_v11 = vpop.f32.mrf.mxu3  ;;  %v625_v10 = vpop.f32.mrf.mxu1  ;;  %v4217_v59 = vld [vmem:[%s3593_s19 + $0x142] sm:$0xff] }
 0x12a   : > { %v626_v19 = vadd.f32 %v625_v10, %v3899_v9 }
 0x12b   : > { %v1225_v33 = vadd.f32 %v1147_v11, %v946_v8  ;;  %v4220_v11 = vld [vmem:[%s3593_s19 + $0x158] sm:$0xff] }
 0x12c   : > { %v1428_v3 = vpop.f32.mrf.mxu0  ;;  %2904 = vmatmul.msk.f32.gmra.mxu1 %vm265_vm1, %v4169_v34 }
 0x12d   : > { %v4205_v28 = vadd.f32 %v1425_v46, %v1225_v33  ;;  %2938 = vmatmul.msk.f32.gmra.mxu2 %vm265_vm1, %v4200_v12 }
 0x12e   : > { %3004 = vmatmul.msk.f32.gmra.mxu3 %vm265_vm1, %v4203_v7 }
 0x12f   : > { %4810 = vst [vmem:[#allocation42_spill] sm:$0xff] %v4205_v28  ;;  %3070 = vmatmul.msk.f32.gmra.mxu0 %vm265_vm1, %v3670_v23 }
 0x130   : > { %v871_v1 = vpop.f32.mrf.mxu2 }
 0x131   : > { %v947_v37 = vadd.f32 %v871_v1, %v626_v19  ;;  %v1150_v15 = vpop.f32.mrf.mxu3  ;;  %v628_v46 = vpop.f32.mrf.mxu1  ;;  %v4234_v1 = vld [vmem:[%s3593_s19 + $0x152] sm:$0xff] }
 0x132   : > { %v629_v23 = vadd.f32 %v628_v46, %v3921_v25 }
 0x133   : > { %v1226_v8 = vadd.f32 %v1150_v15, %v947_v37  ;;  %v2972_v15 = vld [vmem:[%s3593_s19 + $0x168] sm:$0xff] }
 0x134   : > { %v1431_v33 = vpop.f32.mrf.mxu0  ;;  %2905 = vmatmul.msk.f32.gmra.mxu1 %vm265_vm1, %v4186_v38 }
 0x135   : > { %v4222_v28 = vadd.f32 %v1428_v3, %v1226_v8  ;;  %2939 = vmatmul.msk.f32.gmra.mxu2 %vm265_vm1, %v4217_v59 }
 0x136   : > { %3005 = vmatmul.msk.f32.gmra.mxu3 %vm265_vm1, %v4220_v11 }
 0x137   : > { %4811 = vst [vmem:[#allocation43_spill] sm:$0xff] %v4222_v28  ;;  %3071 = vmatmul.msk.f32.gmra.mxu0 %vm265_vm1, %v3702_v30 }
 0x138   : > { %v874_v9 = vpop.f32.mrf.mxu2 }
 0x139   : > { %v948_v10 = vadd.f32 %v874_v9, %v629_v23  ;;  %v1153_v19 = vpop.f32.mrf.mxu3  ;;  %v631_v3 = vpop.f32.mrf.mxu1 }
 0x13a   : > { %v632_v30 = vadd.f32 %v631_v3, %v3943_v42 }
 0x13b   : > { %v1227_v37 = vadd.f32 %v1153_v19, %v948_v10  ;;  %v2973_v19 = vld [vmem:[%s3593_s19 + $0x170] sm:$0xff] }
 0x13c   : > { %v1434_v8 = vpop.f32.mrf.mxu0  ;;  %2906 = vmatmul.msk.f32.gmra.mxu1 %vm265_vm1, %v4203_v7 }
 0x13d   : > { %v4237_v28 = vadd.f32 %v1431_v33, %v1227_v37  ;;  %2940 = vmatmul.msk.f32.gmra.mxu2 %vm265_vm1, %v4234_v1  ;;  %v4248_v33 = vld [vmem:[%s3593_s19 + $0x15a] sm:$0xff] }
 0x13e   : > { %3006 = vmatmul.msk.f32.gmra.mxu3 %vm265_vm1, %v2972_v15  ;;  %4813 = vst [vmem:[#allocation45_spill] sm:$0xff] %v4248_v33 }
 0x13f   : > { %4812 = vst [vmem:[#allocation44_spill] sm:$0xff] %v4237_v28  ;;  %3072 = vmatmul.msk.f32.gmra.mxu0 %vm265_vm1, %v3726_v35 }
 0x140   : > { %v877_v25 = vpop.f32.mrf.mxu2 }
 0x141   : > { %v949_v46 = vadd.f32 %v877_v25, %v632_v30  ;;  %v1156_v23 = vpop.f32.mrf.mxu3  ;;  %v634_v9 = vpop.f32.mrf.mxu1 }
 0x142   : > { %v635_v35 = vadd.f32 %v634_v9, %v3965_v41 }
 0x143   : > { %v1228_v10 = vadd.f32 %v1156_v23, %v949_v46  ;;  %v2974_v23 = vld [vmem:[%s3593_s19 + $0x180] sm:$0xff] }
 0x144   : > { %v1437_v37 = vpop.f32.mrf.mxu0  ;;  %2907 = vmatmul.msk.f32.gmra.mxu1 %vm265_vm1, %v4220_v11 }
 0x145   : > { %v4251_v28 = vadd.f32 %v1434_v8, %v1228_v10  ;;  %2941 = vmatmul.msk.f32.gmra.mxu2 %vm265_vm1, %v4248_v33  ;;  %v4262_v8 = vld [vmem:[%s3593_s19 + $0x16a] sm:$0xff] }
 0x146   : > { %3007 = vmatmul.msk.f32.gmra.mxu3 %vm265_vm1, %v2973_v19 }
 0x147   : > { %4814 = vst [vmem:[#allocation46_spill] sm:$0xff] %v4251_v28  ;;  %3073 = vmatmul.msk.f32.gmra.mxu0 %vm265_vm1, %v3746_v39  ;;  %v4266_v28 = vld [vmem:[%s3593_s19 + $0x181] sm:$0xff] }
 0x148   : > { %v880_v42 = vpop.f32.mrf.mxu2 }
 0x149   : > { %v950_v3 = vadd.f32 %v880_v42, %v635_v35  ;;  %v1159_v30 = vpop.f32.mrf.mxu3  ;;  %v637_v25 = vpop.f32.mrf.mxu1 }
 0x14a   : > { %v638_v39 = vadd.f32 %v637_v25, %v3987_v43 }
 0x14b   : > { %v1229_v46 = vadd.f32 %v1159_v30, %v950_v3  ;;  %v4278_v3 = vld [vmem:[%s3593_s19 + $0x172] sm:$0xff]  ;;  %v2975_v30 = vld [vmem:[%s3593_s19 + $0x188] sm:$0xff] }
 0x14c   : > { %v1440_v10 = vpop.f32.mrf.mxu0  ;;  %2908 = vmatmul.msk.f32.gmra.mxu1 %vm265_vm1, %v2972_v15  ;;  %v4282_v15 = vld [vmem:[%s3593_s19 + $0x189] sm:$0xff] }
 0x14d   : > { %v4268_v33 = vadd.f32 %v1437_v37, %v1229_v46  ;;  %2942 = vmatmul.msk.f32.gmra.mxu2 %vm265_vm1, %v4262_v8 }
 0x14e   : > { %3008 = vmatmul.msk.f32.gmra.mxu3 %vm265_vm1, %v2974_v23 }
 0x14f   : > { %4815 = vst [vmem:[#allocation47_spill] sm:$0xff] %v4268_v33  ;;  %3074 = vmatmul.msk.f32.gmra.mxu0 %vm265_vm1, %v4266_v28 }
 0x150   : > { %v883_v41 = vpop.f32.mrf.mxu2 }
 0x151   : > { %v951_v9 = vadd.f32 %v883_v41, %v638_v39  ;;  %v1162_v35 = vpop.f32.mrf.mxu3  ;;  %v640_v42 = vpop.f32.mrf.mxu1 }
 0x152   : > { %v641_v43 = vadd.f32 %v640_v42, %v4009_v20 }
 0x153   : > { %v1230_v37 = vadd.f32 %v1162_v35, %v951_v9 }
 0x154   : > { %v1443_v46 = vpop.f32.mrf.mxu0  ;;  %2909 = vmatmul.msk.f32.gmra.mxu1 %vm265_vm1, %v2973_v19 }
 0x155   : > { %v4284_v33 = vadd.f32 %v1440_v10, %v1230_v37  ;;  %2943 = vmatmul.msk.f32.gmra.mxu2 %vm265_vm1, %v4278_v3 }
 0x156   : > { %3009 = vmatmul.msk.f32.gmra.mxu3 %vm265_vm1, %v2975_v30 }
 0x157   : > { %3075 = vmatmul.msk.f32.gmra.mxu0 %vm265_vm1, %v4282_v15 }
 0x158   : > { %v886_v25 = vpop.f32.mrf.mxu2 }
 0x159   : > { %v952_v23 = vadd.f32 %v886_v25, %v641_v43  ;;  %v1165_v39 = vpop.f32.mrf.mxu3  ;;  %v643_v41 = vpop.f32.mrf.mxu1 }
 0x15a   : > { %v644_v20 = vadd.f32 %v643_v41, %v3873_v63 }
 0x15b   : > { %v1231_v9 = vadd.f32 %v1165_v39, %v952_v23 }
 0x15c   : > { %v1446_v35 = vpop.f32.mrf.mxu0  ;;  %3110 = vmatmul.msk.f32.vlgmr.msra.gmra.mxu1 %vm265_vm1, %v3774_v47 }
 0x15d   : > { %v4293_v10 = vadd.f32 %v1443_v46, %v1231_v9  ;;  %3176 = vmatmul.msk.f32.vlgmr.msra.gmra.mxu2 %vm265_vm1, %v3777_v48 }
 0x15e   : > { %3242 = vmatmul.msk.f32.vlgmr.msra.gmra.mxu3 %vm265_vm1, %v3673_v24 }
 0x15f   : > { %3308 = vmatmul.msk.f32.vlgmr.msra.gmra.mxu0 %vm265_vm1, %v3800_v51 }
 0x160   : > { %v889_v19 = vpop.f32.mrf.mxu2 }
 0x161   : > { %v953_v42 = vadd.f32 %v889_v19, %v644_v20  ;;  %v1168_v37 = vpop.f32.mrf.mxu3  ;;  %v646_v30 = vpop.f32.mrf.mxu1 }
 0x162   : > { %v647_v24 = vadd.f32 %v646_v30, %v3895_v5 }
 0x163   : > { %v1232_v46 = vadd.f32 %v1168_v37, %v953_v42 }
 0x164   : > { %v1449_v43 = vpop.f32.mrf.mxu0  ;;  %3111 = vmatmul.msk.f32.gmra.mxu1 %vm265_vm1, %v3787_v49 }
 0x165   : > { %v4304_v25 = vadd.f32 %v1446_v35, %v1232_v46  ;;  %3177 = vmatmul.msk.f32.gmra.mxu2 %vm265_vm1, %v3790_v50  ;;  %v3212_v46 = vld [vmem:[%s3593_s19 + $0x61] sm:$0xff] }
 0x166   : > { %3243 = vmatmul.msk.f32.gmra.mxu3 %vm265_vm1, %v3705_v31 }
 0x167   : > { %3309 = vmatmul.msk.f32.gmra.mxu0 %vm265_vm1, %v3814_v53 }
 0x168   : > { %v892_v47 = vpop.f32.mrf.mxu2 }
 0x169   : > { %v954_v48 = vadd.f32 %v892_v47, %v647_v24  ;;  %v1171_v63 = vpop.f32.mrf.mxu3  ;;  %v649_v23 = vpop.f32.mrf.mxu1 }
 0x16a   : > { %v650_v31 = vadd.f32 %v649_v23, %v3917_v17  ;;  %v3213_v23 = vld [vmem:[%s3593_s19 + $0x69] sm:$0xff] }
 0x16b   : > { %v1233_v39 = vadd.f32 %v1171_v63, %v954_v48 }
 0x16c   : > { %v1452_v41 = vpop.f32.mrf.mxu0  ;;  %3112 = vmatmul.msk.f32.gmra.mxu1 %vm265_vm1, %v3800_v51 }
 0x16d   : > { %v4315_v9 = vadd.f32 %v1449_v43, %v1233_v39  ;;  %3178 = vmatmul.msk.f32.gmra.mxu2 %vm265_vm1, %v3803_v52 }
 0x16e   : > { %3244 = vmatmul.msk.f32.gmra.mxu3 %vm265_vm1, %v3729_v36 }
 0x16f   : > { %3310 = vmatmul.msk.f32.gmra.mxu0 %vm265_vm1, %v3828_v55 }
 0x170   : > { %v895_v49 = vpop.f32.mrf.mxu2 }
 0x171   : > { %v955_v50 = vadd.f32 %v895_v49, %v650_v31  ;;  %v1174_v5 = vpop.f32.mrf.mxu3  ;;  %v652_v35 = vpop.f32.mrf.mxu1  ;;  %v4819_v31 = vld [vmem:[#allocation23_spill] sm:$0xff] }
 0x172   : > { %v653_v36 = vadd.f32 %v652_v35, %v3939_v21 }
 0x173   : > { %v1234_v20 = vadd.f32 %v1174_v5, %v955_v50 }
 0x174   : > { %v1455_v19 = vpop.f32.mrf.mxu0  ;;  %3113 = vmatmul.msk.f32.gmra.mxu1 %vm265_vm1, %v3814_v53 }
 0x175   : > { %v4326_v42 = vadd.f32 %v1452_v41, %v1234_v20  ;;  %3179 = vmatmul.msk.f32.gmra.mxu2 %vm265_vm1, %v3817_v54 }
 0x176   : > { %3245 = vmatmul.msk.f32.gmra.mxu3 %vm265_vm1, %v3749_v40  ;;  %v4816_v40 = vld [vmem:[#allocation19_spill] sm:$0xff] }
 0x177   : > { %3311 = vmatmul.msk.f32.gmra.mxu0 %vm265_vm1, %v3842_v57 }
 0x178   : > { %v898_v51 = vpop.f32.mrf.mxu2 }
 0x179   : > { %v956_v52 = vadd.f32 %v898_v51, %v653_v36  ;;  %v1177_v17 = vpop.f32.mrf.mxu3  ;;  %v655_v37 = vpop.f32.mrf.mxu1  ;;  %v3214_v36 = vld [vmem:[%s3593_s19 + $0x79] sm:$0xff] }
 0x17a   : > { %v656_v54 = vadd.f32 %v655_v37, %v4816_v40  ;;  %v4822_v37 = vld [vmem:[#allocation27_spill] sm:$0xff] }
 0x17b   : > { %v1235_v30 = vadd.f32 %v1177_v17, %v956_v52  ;;  %v4821_v17 = vld [vmem:[#allocation11_spill] sm:$0xff] }
 0x17c   : > { %v1458_v43 = vpop.f32.mrf.mxu0  ;;  %3114 = vmatmul.msk.f32.gmra.mxu1 %vm265_vm1, %v3828_v55  ;;  %v4817_v55 = vld [vmem:[#allocation5_spill] sm:$0xff] }
 0x17d   : > { %v4338_v53 = vadd.f32 %v1455_v19, %v1235_v30  ;;  %3180 = vmatmul.msk.f32.gmra.mxu2 %vm265_vm1, %v3831_v56  ;;  %v4818_v56 = vld [vmem:[#allocation8_spill] sm:$0xff] }
 0x17e   : > { %3246 = vmatmul.msk.f32.gmra.mxu3 %vm265_vm1, %v3212_v46 }
 0x17f   : > { %3312 = vmatmul.msk.f32.gmra.mxu0 %vm265_vm1, %v3858_v60 }
 0x180   : > { %v901_v21 = vpop.f32.mrf.mxu2 }
 0x181   : > { %v957_v24 = vadd.f32 %v901_v21, %v656_v54  ;;  %v1180_v47 = vpop.f32.mrf.mxu3  ;;  %v658_v48 = vpop.f32.mrf.mxu1 }
 0x182   : > { %v659_v49 = vadd.f32 %v658_v48, %v4819_v31 }
 0x183   : > { %v1236_v63 = vadd.f32 %v1180_v47, %v957_v24  ;;  %v3215_v24 = vld [vmem:[%s3593_s19 + $0x81] sm:$0xff] }
 0x184   : > { %v1461_v39 = vpop.f32.mrf.mxu0  ;;  %3115 = vmatmul.msk.f32.gmra.mxu1 %vm265_vm1, %v3842_v57  ;;  %v4820_v57 = vld [vmem:[#allocation6_spill] sm:$0xff] }
 0x185   : > { %v4349_v41 = vadd.f32 %v1458_v43, %v1236_v63  ;;  %3181 = vmatmul.msk.f32.gmra.mxu2 %vm265_vm1, %v4817_v55  ;;  %v4824_v63 = vld [vmem:[#allocation14_spill] sm:$0xff] }
 0x186   : > { %3247 = vmatmul.msk.f32.gmra.mxu3 %vm265_vm1, %v3213_v23  ;;  %v4825_v23 = vld [vmem:[#allocation30_spill] sm:$0xff] }
 0x187   : > { %3313 = vmatmul.msk.f32.gmra.mxu0 %vm265_vm1, %v4818_v56 }
 0x188   : > { %v904_v50 = vpop.f32.mrf.mxu2 }
 0x189   : > { %v958_v5 = vadd.f32 %v904_v50, %v659_v49  ;;  %v1183_v35 = vpop.f32.mrf.mxu3  ;;  %v661_v20 = vpop.f32.mrf.mxu1 }
 0x18a   : > { %v662_v30 = vadd.f32 %v661_v20, %v4822_v37 }
 0x18b   : > { %v1237_v19 = vadd.f32 %v1183_v35, %v958_v5  ;;  %v3216_v35 = vld [vmem:[%s3593_s19 + $0x91] sm:$0xff] }
 0x18c   : > { %v1464_v51 = vpop.f32.mrf.mxu0  ;;  %3116 = vmatmul.msk.f32.gmra.mxu1 %vm265_vm1, %v3858_v60  ;;  %v4823_v60 = vld [vmem:[#allocation9_spill] sm:$0xff] }
 0x18d   : > { %v4360_v52 = vadd.f32 %v1461_v39, %v1237_v19  ;;  %3182 = vmatmul.msk.f32.gmra.mxu2 %vm265_vm1, %v4820_v57 }
 0x18e   : > { %3248 = vmatmul.msk.f32.gmra.mxu3 %vm265_vm1, %v3214_v36  ;;  %v4827_v36 = vld [vmem:[#allocation17_spill] sm:$0xff] }
 0x18f   : > { %3314 = vmatmul.msk.f32.gmra.mxu0 %vm265_vm1, %v4821_v17 }
 0x190   : > { %v907_v46 = vpop.f32.mrf.mxu2 }
 0x191   : > { %v959_v43 = vadd.f32 %v907_v46, %v662_v30  ;;  %v1186_v40 = vpop.f32.mrf.mxu3  ;;  %v664_v54 = vpop.f32.mrf.mxu1 }
 0x192   : > { %v665_v39 = vadd.f32 %v664_v54, %v4825_v23  ;;  %v3217_v54 = vld [vmem:[%s3593_s19 + $0x99] sm:$0xff] }
 0x193   : > { %v1238_v21 = vadd.f32 %v1186_v40, %v959_v43 }
 0x194   : > { %v1467_v47 = vpop.f32.mrf.mxu0  ;;  %3117 = vmatmul.msk.f32.gmra.mxu1 %vm265_vm1, %v4818_v56  ;;  %v4826_v56 = vld [vmem:[#allocation12_spill] sm:$0xff] }
 0x195   : > { %v4371_v48 = vadd.f32 %v1464_v51, %v1238_v21  ;;  %3183 = vmatmul.msk.f32.gmra.mxu2 %vm265_vm1, %v4823_v60  ;;  %v4828_v51 = vld [vmem:[#allocation7_spill] sm:$0xff]  ;;  %v4831_v60 = vld [vmem:[#allocation10_spill] sm:$0xff] }
 0x196   : > { %3249 = vmatmul.msk.f32.gmra.mxu3 %vm265_vm1, %v3215_v24 }
 0x197   : > { %3315 = vmatmul.msk.f32.gmra.mxu0 %vm265_vm1, %v4824_v63 }
 0x198   : > { %v910_v55 = vpop.f32.mrf.mxu2 }
 0x199   : > { %v960_v31 = vadd.f32 %v910_v55, %v665_v39  ;;  %v1189_v49 = vpop.f32.mrf.mxu3  ;;  %v667_v50 = vpop.f32.mrf.mxu1 }
 0x19a   : > { %v668_v57 = vadd.f32 %v667_v50, %v4828_v51  ;;  %v4834_v51 = vld [vmem:[#allocation13_spill] sm:$0xff] }
 0x19b   : > { %v1239_v5 = vadd.f32 %v1189_v49, %v960_v31 }
 0x19c   : > { %v1470_v20 = vpop.f32.mrf.mxu0  ;;  %3118 = vmatmul.msk.f32.gmra.mxu1 %vm265_vm1, %v4821_v17  ;;  %v4829_v17 = vld [vmem:[#allocation15_spill] sm:$0xff] }
 0x19d   : > { %v4382_v19 = vadd.f32 %v1467_v47, %v1239_v5  ;;  %3184 = vmatmul.msk.f32.gmra.mxu2 %vm265_vm1, %v4826_v56  ;;  %v4830_v47 = vld [vmem:[#allocation21_spill] sm:$0xff]  ;;  %v3218_v5 = vld [vmem:[%s3593_s19 + $0xa9] sm:$0xff] }
 0x19e   : > { %3250 = vmatmul.msk.f32.gmra.mxu3 %vm265_vm1, %v3216_v35  ;;  %v4833_v56 = vld [vmem:[#allocation25_spill] sm:$0xff] }
 0x19f   : > { %3316 = vmatmul.msk.f32.gmra.mxu0 %vm265_vm1, %v4827_v36 }
 0x1a0   : > { %v913_v37 = vpop.f32.mrf.mxu2 }
 0x1a1   : > { %v961_v30 = vadd.f32 %v913_v37, %v668_v57  ;;  %v1192_v46 = vpop.f32.mrf.mxu3  ;;  %v670_v43 = vpop.f32.mrf.mxu1 }
 0x1a2   : > { %v671_v23 = vadd.f32 %v670_v43, %v4831_v60  ;;  %v4836_v60 = vld [vmem:[#allocation29_spill] sm:$0xff] }
 0x1a3   : > { %v1240_v40 = vadd.f32 %v1192_v46, %v961_v30 }
 0x1a4   : > { %v1473_v21 = vpop.f32.mrf.mxu0  ;;  %3119 = vmatmul.msk.f32.gmra.mxu1 %vm265_vm1, %v4824_v63  ;;  %v4832_v63 = vld [vmem:[#allocation18_spill] sm:$0xff] }
 0x1a5   : > { %v4393_v24 = vadd.f32 %v1470_v20, %v1240_v40  ;;  %3185 = vmatmul.msk.f32.gmra.mxu2 %vm265_vm1, %v4829_v17 }
 0x1a6   : > { %3251 = vmatmul.msk.f32.gmra.mxu3 %vm265_vm1, %v3217_v54  ;;  %v3219_v54 = vld [vmem:[%s3593_s19 + $0xb1] sm:$0xff] }
 0x1a7   : > { %3317 = vmatmul.msk.f32.gmra.mxu0 %vm265_vm1, %v4830_v47 }
 0x1a8   : > { %v916_v39 = vpop.f32.mrf.mxu2 }
 0x1a9   : > { %v962_v55 = vadd.f32 %v916_v39, %v671_v23  ;;  %v1195_v31 = vpop.f32.mrf.mxu3  ;;  %v673_v49 = vpop.f32.mrf.mxu1  ;;  %v4837_v23 = vld [vmem:[#allocation16_spill] sm:$0xff] }
 0x1aa   : > { %v674_v57 = vadd.f32 %v673_v49, %v4834_v51 }
 0x1ab   : > { %v1241_v50 = vadd.f32 %v1195_v31, %v962_v55 }
 0x1ac   : > { %v1476_v35 = vpop.f32.mrf.mxu0  ;;  %3120 = vmatmul.msk.f32.gmra.mxu1 %vm265_vm1, %v4827_v36  ;;  %v4835_v36 = vld [vmem:[#allocation22_spill] sm:$0xff] }
 0x1ad   : > { %v4404_v20 = vadd.f32 %v1473_v21, %v1241_v50  ;;  %3186 = vmatmul.msk.f32.gmra.mxu2 %vm265_vm1, %v4832_v63 }
 0x1ae   : > { %3252 = vmatmul.msk.f32.gmra.mxu3 %vm265_vm1, %v3218_v5 }
 0x1af   : > { %3318 = vmatmul.msk.f32.gmra.mxu0 %vm265_vm1, %v4833_v56 }
 0x1b0   : > { %v919_v37 = vpop.f32.mrf.mxu2 }
 0x1b1   : > { %v963_v30 = vadd.f32 %v919_v37, %v674_v57  ;;  %v1198_v46 = vpop.f32.mrf.mxu3  ;;  %v676_v43 = vpop.f32.mrf.mxu1  ;;  %v4839_v57 = vld [vmem:[#allocation32_spill] sm:$0xff] }
 0x1b2   : > { %v677_v39 = vadd.f32 %v676_v43, %v4837_v23  ;;  %v4840_v37 = vld [vmem:[#allocation20_spill] sm:$0xff] }
 0x1b3   : > { %v1242_v40 = vadd.f32 %v1198_v46, %v963_v30 }
 0x1b4   : > { %v1479_v21 = vpop.f32.mrf.mxu0  ;;  %3121 = vmatmul.msk.f32.gmra.mxu1 %vm265_vm1, %v4830_v47  ;;  %v4838_v47 = vld [vmem:[#allocation26_spill] sm:$0xff] }
 0x1b5   : > { %v4415_v17 = vadd.f32 %v1476_v35, %v1242_v40  ;;  %3187 = vmatmul.msk.f32.gmra.mxu2 %vm265_vm1, %v4835_v36  ;;  %v3220_v35 = vld [vmem:[%s3593_s19 + $0xc1] sm:$0xff]  ;;  %v3221_v36 = vld [vmem:[%s3593_s19 + $0xc9] sm:$0xff] }
 0x1b6   : > { %3253 = vmatmul.msk.f32.gmra.mxu3 %vm265_vm1, %v3219_v54 }
 0x1b7   : > { %3319 = vmatmul.msk.f32.gmra.mxu0 %vm265_vm1, %v4836_v60 }
 0x1b8   : > { %v922_v55 = vpop.f32.mrf.mxu2 }
 0x1b9   : > { %v964_v31 = vadd.f32 %v922_v55, %v677_v39  ;;  %v1201_v49 = vpop.f32.mrf.mxu3  ;;  %v679_v50 = vpop.f32.mrf.mxu1 }
 0x1ba   : > { %v680_v30 = vadd.f32 %v679_v50, %v4840_v37 }
 0x1bb   : > { %v1243_v5 = vadd.f32 %v1201_v49, %v964_v31 }
 0x1bc   : > { %v1482_v63 = vpop.f32.mrf.mxu0  ;;  %3122 = vmatmul.msk.f32.gmra.mxu1 %vm265_vm1, %v4833_v56  ;;  %v4841_v56 = vld [vmem:[#allocation24_spill] sm:$0xff] }
 0x1bd   : > { %v4426_v51 = vadd.f32 %v1479_v21, %v1243_v5  ;;  %3188 = vmatmul.msk.f32.gmra.mxu2 %vm265_vm1, %v4838_v47 }
 0x1be   : > { %3254 = vmatmul.msk.f32.gmra.mxu3 %vm265_vm1, %v3220_v35 }
 0x1bf   : > { %3320 = vmatmul.msk.f32.gmra.mxu0 %vm265_vm1, %v4839_v57 }
 0x1c0   : > { %v925_v46 = vpop.f32.mrf.mxu2 }
 0x1c1   : > { %v965_v43 = vadd.f32 %v925_v46, %v680_v30  ;;  %v1204_v40 = vpop.f32.mrf.mxu3  ;;  %v682_v54 = vpop.f32.mrf.mxu1 }
 0x1c2   : > { %v683_v55 = vadd.f32 %v682_v54, %v4841_v56 }
 0x1c3   : > { %v1244_v21 = vadd.f32 %v1204_v40, %v965_v43 }
 0x1c4   : > { %v1485_v23 = vpop.f32.mrf.mxu0  ;;  %3123 = vmatmul.msk.f32.gmra.mxu1 %vm265_vm1, %v4836_v60 }
 0x1c5   : > { %v4437_v39 = vadd.f32 %v1482_v63, %v1244_v21  ;;  %3189 = vmatmul.msk.f32.gmra.mxu2 %vm265_vm1, %v4015_v44  ;;  %v3222_v63 = vld [vmem:[%s3593_s19 + $0xd9] sm:$0xff]  ;;  %v3223_v21 = vld [vmem:[%s3593_s19 + $0xe1] sm:$0xff] }
 0x1c6   : > { %3255 = vmatmul.msk.f32.gmra.mxu3 %vm265_vm1, %v3221_v36  ;;  %v4842_v44 = vld [vmem:[#allocation28_spill] sm:$0xff] }
 0x1c7   : > { %3321 = vmatmul.msk.f32.gmra.mxu0 %vm265_vm1, %v4047_v2 }
 0x1c8   : > { %v928_v31 = vpop.f32.mrf.mxu2 }
 0x1c9   : > { %v966_v49 = vadd.f32 %v928_v31, %v683_v55  ;;  %v1207_v50 = vpop.f32.mrf.mxu3  ;;  %v685_v5 = vpop.f32.mrf.mxu1 }
 0x1ca   : > { %v686_v60 = vadd.f32 %v685_v5, %v4842_v44  ;;  %v3224_v5 = vld [vmem:[%s3593_s19 + $0xf1] sm:$0xff] }
 0x1cb   : > { %v1245_v35 = vadd.f32 %v1207_v50, %v966_v49 }
 0x1cc   : > { %v1488_v47 = vpop.f32.mrf.mxu0  ;;  %3124 = vmatmul.msk.f32.gmra.mxu1 %vm265_vm1, %v4839_v57 }
 0x1cd   : > { %v4448_v37 = vadd.f32 %v1485_v23, %v1245_v35  ;;  %3190 = vmatmul.msk.f32.gmra.mxu2 %vm265_vm1, %v4035_v61  ;;  %v4843_v61 = vld [vmem:[#allocation31_spill] sm:$0xff] }
 0x1ce   : > { %3256 = vmatmul.msk.f32.gmra.mxu3 %vm265_vm1, %v3222_v63 }
 0x1cf   : > { %3322 = vmatmul.msk.f32.gmra.mxu0 %vm265_vm1, %v4064_v27 }
 0x1d0   : > { %v931_v30 = vpop.f32.mrf.mxu2 }
 0x1d1   : > { %v967_v46 = vadd.f32 %v931_v30, %v686_v60  ;;  %v1210_v43 = vpop.f32.mrf.mxu3  ;;  %v688_v40 = vpop.f32.mrf.mxu1 }
 0x1d2   : > { %v689_v57 = vadd.f32 %v688_v40, %v4843_v61 }
 0x1d3   : > { %v1246_v54 = vadd.f32 %v1210_v43, %v967_v46  ;;  %v3225_v43 = vld [vmem:[%s3593_s19 + $0xf9] sm:$0xff] }
 0x1d4   : > { %v1491_v36 = vpop.f32.mrf.mxu0  ;;  %3125 = vmatmul.msk.f32.gmra.mxu1 %vm265_vm1, %v4047_v2 }
 0x1d5   : > { %v4459_v23 = vadd.f32 %v1488_v47, %v1246_v54  ;;  %3191 = vmatmul.msk.f32.gmra.mxu2 %vm265_vm1, %v4050_v58  ;;  %v4844_v58 = vld [vmem:[#allocation33_spill] sm:$0xff]  ;;  %v4845_v54 = vld [vmem:[#allocation34_spill] sm:$0xff] }
 0x1d6   : > { %3257 = vmatmul.msk.f32.gmra.mxu3 %vm265_vm1, %v3223_v21 }
 0x1d7   : > { %3323 = vmatmul.msk.f32.gmra.mxu0 %vm265_vm1, %v4081_v62 }
 0x1d8   : > { %v934_v56 = vpop.f32.mrf.mxu2 }
 0x1d9   : > { %v968_v55 = vadd.f32 %v934_v56, %v689_v57  ;;  %v1213_v31 = vpop.f32.mrf.mxu3  ;;  %v1676_v49 = vpop.f32.mrf.mxu1 }
 0x1da   : > { %v1772_v63 = vadd.f32 %v1676_v49, %v4844_v58 }
 0x1db   : > { %v1247_v50 = vadd.f32 %v1213_v31, %v968_v55 }
 0x1dc   : > { %v2511_v35 = vpop.f32.mrf.mxu0  ;;  %3126 = vmatmul.msk.f32.gmra.mxu1 %vm265_vm1, %v4064_v27  ;;  %v4484_v27 = vld [vmem:[%s4744_s2] ss:$0 sm:$0xff] }
 0x1dd   : > { %v4470_v2 = vadd.f32 %v1491_v36, %v1247_v50  ;;  %3192 = vmatmul.msk.f32.gmra.mxu2 %vm265_vm1, %v4067_v6 }
 0x1de   : > { %3258 = vmatmul.msk.f32.gmra.mxu3 %vm265_vm1, %v3224_v5  ;;  %v4846_v5 = vld [vmem:[#allocation35_spill] sm:$0xff] }
 0x1df   : > { %3324 = vmatmul.msk.f32.gmra.mxu0 %vm265_vm1, %v4098_v4 }
 0x1e0   : > { %v1955_v47 = vpop.f32.mrf.mxu2 }
 0x1e1   : > { %v2051_v44 = vadd.f32 %v1955_v47, %v1772_v63  ;;  %v2233_v60 = vpop.f32.mrf.mxu3  ;;  %v1679_v30 = vpop.f32.mrf.mxu1 }
 0x1e2   : > { %v1773_v21 = vadd.f32 %v1679_v30, %v4845_v54 }
 0x1e3   : > { %v2329_v46 = vadd.f32 %v2233_v60, %v2051_v44 }
 0x1e4   : > { %v2514_v6 = vpop.f32.mrf.mxu0  ;;  %3127 = vmatmul.msk.f32.gmra.mxu1 %vm265_vm1, %v4081_v62 }
 0x1e5   : > { %v2607_v40 = vadd.f32 %v2511_v35, %v2329_v46  ;;  %3193 = vmatmul.msk.f32.gmra.mxu2 %vm265_vm1, %v4084_v13  ;;  %v3226_v13 = vld [vmem:[%s3593_s19 + $0x109] sm:$0xff]  ;;  %v3227_v46 = vld [vmem:[%s3593_s19 + $0x111] sm:$0xff] }
 0x1e6   : > { %3259 = vmatmul.msk.f32.gmra.mxu3 %vm265_vm1, %v3225_v43 }
 0x1e7   : > { %3325 = vmatmul.msk.f32.gmra.mxu0 %vm265_vm1, %v4115_v16  ;;  %v2643_v36 = vadd.f32 %v4484_v27, %v2607_v40 }
 0x1e8   : > { %v1958_v61 = vpop.f32.mrf.mxu2 }
 0x1e9   : > { %v2675_v57 = vmax.f32 %v2643_v36, 0.0  ;;  %v2052_v56 = vadd.f32 %v1958_v61, %v1773_v21  ;;  %v2236_v55 = vpop.f32.mrf.mxu3  ;;  %v1682_v31 = vpop.f32.mrf.mxu1 }
 0x1ea   : > { %v1774_v35 = vadd.f32 %v1682_v31, %v4846_v5 }
 0x1eb   : > { %2707 = vst [vmem:[%s4498_s9] sm:$0xff] %v2675_v57  ;;  %v2330_v62 = vadd.f32 %v2236_v55, %v2052_v56  ;;  %v3228_v55 = vld [vmem:[%s3593_s19 + $0x121] sm:$0xff] }
 0x1ec   : > { %v2517_v49 = vpop.f32.mrf.mxu0  ;;  %3128 = vmatmul.msk.f32.gmra.mxu1 %vm265_vm1, %v4098_v4 }
 0x1ed   : > { %v2608_v50 = vadd.f32 %v2514_v6, %v2330_v62  ;;  %3194 = vmatmul.msk.f32.gmra.mxu2 %vm265_vm1, %v4101_v14  ;;  %v4847_v6 = vld [vmem:[#allocation36_spill] sm:$0xff]  ;;  %v4848_v62 = vld [vmem:[#allocation37_spill] sm:$0xff] }
 0x1ee   : > { %3260 = vmatmul.msk.f32.gmra.mxu3 %vm265_vm1, %v3226_v13 }
 0x1ef   : > { %3326 = vmatmul.msk.f32.gmra.mxu0 %vm265_vm1, %v4132_v32  ;;  %v2644_v58 = vadd.f32 %v4484_v27, %v2608_v50 }
 0x1f0   : > { %v1961_v63 = vpop.f32.mrf.mxu2 }
 0x1f1   : > { %v2676_v47 = vmax.f32 %v2644_v58, 0.0  ;;  %v2053_v44 = vadd.f32 %v1961_v63, %v1774_v35  ;;  %v2239_v60 = vpop.f32.mrf.mxu3  ;;  %v1685_v30 = vpop.f32.mrf.mxu1 }
 0x1f2   : > { %v1775_v40 = vadd.f32 %v1685_v30, %v4847_v6 }
 0x1f3   : > { %2708 = vst [vmem:[%s4498_s9 + $0x8] sm:$0xff] %v2676_v47  ;;  %v2331_v4 = vadd.f32 %v2239_v60, %v2053_v44  ;;  %v3229_v47 = vld [vmem:[%s3593_s19 + $0x129] sm:$0xff] }
 0x1f4   : > { %v2520_v14 = vpop.f32.mrf.mxu0  ;;  %3129 = vmatmul.msk.f32.gmra.mxu1 %vm265_vm1, %v4115_v16  ;;  %v4849_v60 = vld [vmem:[#allocation38_spill] sm:$0xff] }
 0x1f5   : > { %v2609_v43 = vadd.f32 %v2517_v49, %v2331_v4  ;;  %3195 = vmatmul.msk.f32.gmra.mxu2 %vm265_vm1, %v4118_v18 }
 0x1f6   : > { %3261 = vmatmul.msk.f32.gmra.mxu3 %vm265_vm1, %v3227_v46 }
 0x1f7   : > { %3327 = vmatmul.msk.f32.gmra.mxu0 %vm265_vm1, %v4149_v45  ;;  %v2645_v54 = vadd.f32 %v4484_v27, %v2609_v43 }
 0x1f8   : > { %v1964_v21 = vpop.f32.mrf.mxu2 }
 0x1f9   : > { %v2677_v36 = vmax.f32 %v2645_v54, 0.0  ;;  %v2054_v61 = vadd.f32 %v1964_v21, %v1775_v40  ;;  %v2242_v57 = vpop.f32.mrf.mxu3  ;;  %v1688_v56 = vpop.f32.mrf.mxu1  ;;  %v3230_v54 = vld [vmem:[%s3593_s19 + $0x139] sm:$0xff] }
 0x1fa   : > { %v1776_v13 = vadd.f32 %v1688_v56, %v4848_v62  ;;  %v3231_v62 = vld [vmem:[%s3593_s19 + $0x141] sm:$0xff] }
 0x1fb   : > { %2709 = vst [vmem:[%s4498_s9 + $0x10] sm:$0xff] %v2677_v36  ;;  %v2332_v16 = vadd.f32 %v2242_v57, %v2054_v61  ;;  %v4850_v36 = vld [vmem:[#allocation39_spill] sm:$0xff] }
 0x1fc   : > { %v2523_v18 = vpop.f32.mrf.mxu0  ;;  %3130 = vmatmul.msk.f32.gmra.mxu1 %vm265_vm1, %v4132_v32 }
 0x1fd   : > { %v2610_v31 = vadd.f32 %v2520_v14, %v2332_v16  ;;  %3196 = vmatmul.msk.f32.gmra.mxu2 %vm265_vm1, %v4135_v22 }
 0x1fe   : > { %3262 = vmatmul.msk.f32.gmra.mxu3 %vm265_vm1, %v3228_v55 }
 0x1ff   : > { %3328 = vmatmul.msk.f32.gmra.mxu0 %vm265_vm1, %v4166_v0  ;;  %v2646_v49 = vadd.f32 %v4484_v27, %v2610_v31 }
 0x200   : > { %v1967_v50 = vpop.f32.mrf.mxu2 }
 0x201   : > { %v2678_v5 = vmax.f32 %v2646_v49, 0.0  ;;  %v2055_v35 = vadd.f32 %v1967_v50, %v1776_v13  ;;  %v2245_v58 = vpop.f32.mrf.mxu3  ;;  %v1691_v63 = vpop.f32.mrf.mxu1  ;;  %v4851_v49 = vld [vmem:[#allocation40_spill] sm:$0xff] }
 0x202   : > { %v1777_v30 = vadd.f32 %v1691_v63, %v4849_v60  ;;  %v4852_v60 = vld [vmem:[#allocation41_spill] sm:$0xff] }
 0x203   : > { %2710 = vst [vmem:[%s4498_s9 + $0x18] sm:$0xff] %v2678_v5  ;;  %v2333_v32 = vadd.f32 %v2245_v58, %v2055_v35 }
 0x204   : > { %v2526_v22 = vpop.f32.mrf.mxu0  ;;  %3131 = vmatmul.msk.f32.gmra.mxu1 %vm265_vm1, %v4149_v45 }
 0x205   : > { %v2611_v44 = vadd.f32 %v2523_v18, %v2333_v32  ;;  %3197 = vmatmul.msk.f32.gmra.mxu2 %vm265_vm1, %v4152_v29 }
 0x206   : > { %3263 = vmatmul.msk.f32.gmra.mxu3 %vm265_vm1, %v3229_v47 }
 0x207   : > { %3329 = vmatmul.msk.f32.gmra.mxu0 %vm265_vm1, %v4183_v26  ;;  %v2647_v4 = vadd.f32 %v4484_v27, %v2611_v44 }
 0x208   : > { %v1970_v46 = vpop.f32.mrf.mxu2 }
 0x209   : > { %v2679_v14 = vmax.f32 %v2647_v4, 0.0  ;;  %v2056_v43 = vadd.f32 %v1970_v46, %v1777_v30  ;;  %v2248_v6 = vpop.f32.mrf.mxu3  ;;  %v1694_v40 = vpop.f32.mrf.mxu1 }
 0x20a   : > { %v1778_v61 = vadd.f32 %v1694_v40, %v4850_v36 }
 0x20b   : > { %2711 = vst [vmem:[%s4498_s9 + $0x20] sm:$0xff] %v2679_v14  ;;  %v2334_v45 = vadd.f32 %v2248_v6, %v2056_v43 }
 0x20c   : > { %v2529_v29 = vpop.f32.mrf.mxu0  ;;  %3132 = vmatmul.msk.f32.gmra.mxu1 %vm265_vm1, %v4166_v0 }
 0x20d   : > { %v2612_v21 = vadd.f32 %v2526_v22, %v2334_v45  ;;  %3198 = vmatmul.msk.f32.gmra.mxu2 %vm265_vm1, %v4169_v34  ;;  %v3232_v22 = vld [vmem:[%s3593_s19 + $0x151] sm:$0xff]  ;;  %v3233_v45 = vld [vmem:[%s3593_s19 + $0x159] sm:$0xff] }
 0x20e   : > { %3264 = vmatmul.msk.f32.gmra.mxu3 %vm265_vm1, %v3230_v54 }
 0x20f   : > { %3330 = vmatmul.msk.f32.gmra.mxu0 %vm265_vm1, %v4200_v12  ;;  %v2648_v57 = vadd.f32 %v4484_v27, %v2612_v21 }
 0x210   : > { %v1973_v56 = vpop.f32.mrf.mxu2 }
 0x211   : > { %v2680_v16 = vmax.f32 %v2648_v57, 0.0  ;;  %v2057_v55 = vadd.f32 %v1973_v56, %v1778_v61  ;;  %v2251_v18 = vpop.f32.mrf.mxu3  ;;  %v1697_v31 = vpop.f32.mrf.mxu1 }
 0x212   : > { %v1779_v50 = vadd.f32 %v1697_v31, %v4851_v49  ;;  %v3168_v31 = vld [vmem:[%s3593_s19 + $0x168] sm:$0xff] }
 0x213   : > { %2712 = vst [vmem:[%s4498_s9 + $0x28] sm:$0xff] %v2680_v16  ;;  %v2335_v0 = vadd.f32 %v2251_v18, %v2057_v55  ;;  %v3102_v18 = vld [vmem:[%s3593_s19 + $0x152] sm:$0xff] }
 0x214   : > { %v2532_v34 = vpop.f32.mrf.mxu0  ;;  %3133 = vmatmul.msk.f32.gmra.mxu1 %vm265_vm1, %v4183_v26 }
 0x215   : > { %v2613_v13 = vadd.f32 %v2529_v29, %v2335_v0  ;;  %3199 = vmatmul.msk.f32.gmra.mxu2 %vm265_vm1, %v4186_v38  ;;  %v4854_v29 = vld [vmem:[#allocation42_spill] sm:$0xff] }
 0x216   : > { %3265 = vmatmul.msk.f32.gmra.mxu3 %vm265_vm1, %v3231_v62 }
 0x217   : > { %3331 = vmatmul.msk.f32.gmra.mxu0 %vm265_vm1, %v4217_v59  ;;  %v2649_v5 = vadd.f32 %v4484_v27, %v2613_v13 }
 0x218   : > { %v1976_v35 = vpop.f32.mrf.mxu2 }
 0x219   : > { %v2681_v58 = vmax.f32 %v2649_v5, 0.0  ;;  %v2058_v63 = vadd.f32 %v1976_v35, %v1779_v50  ;;  %v2254_v32 = vpop.f32.mrf.mxu3  ;;  %v1700_v47 = vpop.f32.mrf.mxu1 }
 0x21a   : > { %v1780_v30 = vadd.f32 %v1700_v47, %v4852_v60  ;;  %v3169_v47 = vld [vmem:[%s3593_s19 + $0x170] sm:$0xff] }
 0x21b   : > { %2713 = vst [vmem:[%s4498_s9 + $0x30] sm:$0xff] %v2681_v58  ;;  %v2336_v26 = vadd.f32 %v2254_v32, %v2058_v63  ;;  %v3103_v32 = vld [vmem:[%s3593_s19 + $0x15a] sm:$0xff] }
 0x21c   : > { %v2535_v38 = vpop.f32.mrf.mxu0  ;;  %3134 = vmatmul.msk.f32.gmra.mxu1 %vm265_vm1, %v4200_v12 }
 0x21d   : > { %v2614_v44 = vadd.f32 %v2532_v34, %v2336_v26  ;;  %3200 = vmatmul.msk.f32.gmra.mxu2 %vm265_vm1, %v4203_v7  ;;  %v4855_v34 = vld [vmem:[#allocation43_spill] sm:$0xff] }
 0x21e   : > { %3266 = vmatmul.msk.f32.gmra.mxu3 %vm265_vm1, %v3232_v22  ;;  %v3235_v22 = vld [vmem:[%s3593_s19 + $0x171] sm:$0xff] }
 0x21f   : > { %3332 = vmatmul.msk.f32.gmra.mxu0 %vm265_vm1, %v4234_v1  ;;  %v2650_v4 = vadd.f32 %v4484_v27, %v2614_v44  ;;  %v4853_v1 = vld [vmem:[#allocation45_spill] sm:$0xff] }
 0x220   : > { %v1979_v46 = vpop.f32.mrf.mxu2 }
 0x221   : > { %v2682_v14 = vmax.f32 %v2650_v4, 0.0  ;;  %v2059_v43 = vadd.f32 %v1979_v46, %v1780_v30  ;;  %v2257_v6 = vpop.f32.mrf.mxu3  ;;  %v1703_v40 = vpop.f32.mrf.mxu1 }
 0x222   : > { %v1781_v21 = vadd.f32 %v1703_v40, %v4854_v29  ;;  %v3104_v40 = vld [vmem:[%s3593_s19 + $0x16a] sm:$0xff] }
 0x223   : > { %2714 = vst [vmem:[%s4498_s9 + $0x38] sm:$0xff] %v2682_v14  ;;  %v2337_v12 = vadd.f32 %v2257_v6, %v2059_v43 }
 0x224   : > { %v2538_v7 = vpop.f32.mrf.mxu0  ;;  %3135 = vmatmul.msk.f32.gmra.mxu1 %vm265_vm1, %v4217_v59 }
 0x225   : > { %v2615_v54 = vadd.f32 %v2535_v38, %v2337_v12  ;;  %3201 = vmatmul.msk.f32.gmra.mxu2 %vm265_vm1, %v4220_v11  ;;  %v3234_v11 = vld [vmem:[%s3593_s19 + $0x169] sm:$0xff]  ;;  %v3170_v12 = vld [vmem:[%s3593_s19 + $0x180] sm:$0xff] }
 0x226   : > { %3267 = vmatmul.msk.f32.gmra.mxu3 %vm265_vm1, %v3233_v45 }
 0x227   : > { %3333 = vmatmul.msk.f32.gmra.mxu0 %vm265_vm1, %v4853_v1  ;;  %v2651_v36 = vadd.f32 %v4484_v27, %v2615_v54  ;;  %v3302_v54 = vld [vmem:[%s3593_s19 + $0x182] sm:$0xff] }
 0x228   : > { %v1982_v61 = vpop.f32.mrf.mxu2 }
 0x229   : > { %v2683_v57 = vmax.f32 %v2651_v36, 0.0  ;;  %v2060_v56 = vadd.f32 %v1982_v61, %v1781_v21  ;;  %v2260_v16 = vpop.f32.mrf.mxu3  ;;  %v1706_v55 = vpop.f32.mrf.mxu1 }
 0x22a   : > { %v1782_v13 = vadd.f32 %v1706_v55, %v4855_v34  ;;  %v3105_v55 = vld [vmem:[%s3593_s19 + $0x172] sm:$0xff] }
 0x22b   : > { %2715 = vst [vmem:[%s4498_s9 + $0x40] sm:$0xff] %v2683_v57  ;;  %v2338_v59 = vadd.f32 %v2260_v16, %v2060_v56 }
 0x22c   : > { %v2541_v0 = vpop.f32.mrf.mxu0  ;;  %3136 = vmatmul.msk.f32.gmra.mxu1 %vm265_vm1, %v3102_v18  ;;  %v3171_v18 = vld [vmem:[%s3593_s19 + $0x188] sm:$0xff] }
 0x22d   : > { %v2616_v62 = vadd.f32 %v2538_v7, %v2338_v59  ;;  %3202 = vmatmul.msk.f32.gmra.mxu2 %vm265_vm1, %v3168_v31 }
 0x22e   : > { %3268 = vmatmul.msk.f32.gmra.mxu3 %vm265_vm1, %v3234_v11  ;;  %v3303_v11 = vld [vmem:[%s3593_s19 + $0x18a] sm:$0xff] }
 0x22f   : > { %3334 = vmatmul.msk.f32.gmra.mxu0 %vm265_vm1, %v4262_v8  ;;  %v2652_v49 = vadd.f32 %v4484_v27, %v2616_v62  ;;  %v4856_v8 = vld [vmem:[#allocation44_spill] sm:$0xff] }
 0x230   : > { %v1985_v50 = vpop.f32.mrf.mxu2 }
 0x231   : > { %v2684_v5 = vmax.f32 %v2652_v49, 0.0  ;;  %v2061_v35 = vadd.f32 %v1985_v50, %v1782_v13  ;;  %v2263_v58 = vpop.f32.mrf.mxu3  ;;  %v1709_v63 = vpop.f32.mrf.mxu1 }
 0x232   : > { %v1783_v60 = vadd.f32 %v1709_v63, %v4856_v8 }
 0x233   : > { %2716 = vst [vmem:[%s4498_s9 + $0x48] sm:$0xff] %v2684_v5  ;;  %v2339_v26 = vadd.f32 %v2263_v58, %v2061_v35  ;;  %v3172_v58 = vld [vmem:[%s3593_s19 + $0x198] sm:$0xff] }
 0x234   : > { %v2544_v38 = vpop.f32.mrf.mxu0  ;;  %3137 = vmatmul.msk.f32.gmra.mxu1 %vm265_vm1, %v3103_v32  ;;  %v3238_v32 = vld [vmem:[%s3593_s19 + $0x199] sm:$0xff] }
 0x235   : > { %v2617_v44 = vadd.f32 %v2541_v0, %v2339_v26  ;;  %3203 = vmatmul.msk.f32.gmra.mxu2 %vm265_vm1, %v3169_v47  ;;  %v4858_v0 = vld [vmem:[#allocation47_spill] sm:$0xff]  ;;  %v3304_v26 = vld [vmem:[%s3593_s19 + $0x19a] sm:$0xff] }
 0x236   : > { %3269 = vmatmul.msk.f32.gmra.mxu3 %vm265_vm1, %v3235_v22 }
 0x237   : > { %3335 = vmatmul.msk.f32.gmra.mxu0 %vm265_vm1, %v4278_v3  ;;  %v2653_v30 = vadd.f32 %v4484_v27, %v2617_v44  ;;  %v4857_v3 = vld [vmem:[#allocation46_spill] sm:$0xff] }
 0x238   : > { %v1988_v4 = vpop.f32.mrf.mxu2 }
 0x239   : > { %v2685_v46 = vmax.f32 %v2653_v30, 0.0  ;;  %v2062_v14 = vadd.f32 %v1988_v4, %v1783_v60  ;;  %v2266_v43 = vpop.f32.mrf.mxu3  ;;  %v1712_v6 = vpop.f32.mrf.mxu1 }
 0x23a   : > { %v1784_v29 = vadd.f32 %v1712_v6, %v4857_v3 }
 0x23b   : > { %2717 = vst [vmem:[%s4498_s9 + $0x50] sm:$0xff] %v2685_v46  ;;  %v2340_v45 = vadd.f32 %v2266_v43, %v2062_v14  ;;  %v3173_v46 = vld [vmem:[%s3593_s19 + $0x1a0] sm:$0xff] }
 0x23c   : > { %v2547_v7 = vpop.f32.mrf.mxu0  ;;  %3138 = vmatmul.msk.f32.gmra.mxu1 %vm265_vm1, %v3104_v40  ;;  %v3239_v43 = vld [vmem:[%s3593_s19 + $0x1a1] sm:$0xff] }
 0x23d   : > { %v2618_v1 = vadd.f32 %v2544_v38, %v2340_v45  ;;  %3204 = vmatmul.msk.f32.gmra.mxu2 %vm265_vm1, %v3170_v12  ;;  %v3305_v40 = vld [vmem:[%s3593_s19 + $0x1a2] sm:$0xff]  ;;  %s2752_s19 = scalar_lea.hbm %s4745_s3, %s3345_s10 }
 0x23e   : > { %3270 = vmatmul.msk.f32.gmra.mxu3 %vm265_vm1, %v4266_v28  ;;  %s2755_s23 = sshll.u32 %s2752_s19, 4  ;;  %s2756_s23 = int_to_ptr.hbm [resolvable:$true] %s2755_s23 }
 0x23f   : > { %3336 = vmatmul.msk.f32.gmra.mxu0 %vm265_vm1, %v3302_v54  ;;  %v2654_v21 = vadd.f32 %v4484_v27, %v2618_v1  ;;  %s3422_s26 = sshra.s32 %s2756_s23, 4  ;;  %s3423_s26 = int_to_ptr.hbm [resolvable:$true] %s3422_s26 }
 0x240   : > { %v1991_v36 = vpop.f32.mrf.mxu2  ;;  %s3424_s27 = scalar_lea.hbm %s3423_s26, 256  ;;  %p3429_p1 = scmp.lt.s32.totalorder %s3423_s26, %s4745_s3 }
 0x241   : > { %v2686_v61 = vmax.f32 %v2654_v21, 0.0  ;;  %v2063_v57 = vadd.f32 %v1991_v36, %v1784_v29  ;;  %v2269_v56 = vpop.f32.mrf.mxu3  ;;  %v1715_v16 = vpop.f32.mrf.mxu1  ;;  %p3425_p12 = scmp.ne.s32.totalorder %s3423_s26, %s3424_s27  ;;  %p3430_p2 = scmp.lt.s32.totalorder %s3428_s30, %s3424_s27 }
 0x242   : > { %v1785_v62 = vadd.f32 %v1715_v16, %v4858_v0 }
 0x243   : > { %2718 = vst [vmem:[%s4498_s9 + $0x58] sm:$0xff] %v2686_v61  ;;  %v2341_v31 = vadd.f32 %v2269_v56, %v2063_v57  ;;  %p3426_p13 = pnand %p3425_p12, %p3550_p4  ;;  %p3431_p3 = por %p3430_p2, %p3429_p1 }
 0x244   : > { %v2550_v59 = vpop.f32.mrf.mxu0  ;;  %3139 = vmatmul.msk.f32.gmra.mxu1 %vm265_vm1, %v3105_v55 }
 0x245   : > { %v2619_v28 = vadd.f32 %v2547_v7, %v2341_v31  ;;  %3205 = vmatmul.msk.f32.gmra.mxu2 %vm265_vm1, %v3171_v18  ;;  %p3427_p0 = pneg %p3426_p13 }
 0x246   : > { %3271 = vmatmul.msk.f32.gmra.mxu3 %vm265_vm1, %v4282_v15 }
 0x247   : > { %3337 = vmatmul.msk.f32.gmra.mxu0 %vm265_vm1, %v3303_v11  ;;  %v2655_v34 = vadd.f32 %v4484_v27, %v2619_v28  ;;  %p3432_p5 = pnand %p3431_p3, %p3427_p0 }
 0x248   : > { %v1994_v13 = vpop.f32.mrf.mxu2 }
 0x249   : > { %v2687_v49 = vmax.f32 %v2655_v34, 0.0  ;;  %v2064_v50 = vadd.f32 %v1994_v13, %v1785_v62  ;;  %v2272_v5 = vpop.f32.mrf.mxu3  ;;  %v1718_v35 = vpop.f32.mrf.mxu1 }
 0x24a   : > { %v1786_v22 = vadd.f32 %v1718_v35, %v4284_v33 }
 0x24b   : > { %2719 = vst [vmem:[%s4498_s9 + $0x60] sm:$0xff] %v2687_v49  ;;  %v2342_v63 = vadd.f32 %v2272_v5, %v2064_v50 }
 0x24c   : > { %v2553_v47 = vpop.f32.mrf.mxu0  ;;  %3140 = vmatmul.msk.f32.gmra.mxu1 %vm265_vm1, %v3302_v54 }
 0x24d   : > { %v2620_v15 = vadd.f32 %v2550_v59, %v2342_v63  ;;  %3206 = vmatmul.msk.f32.gmra.mxu2 %vm265_vm1, %v3172_v58 }
 0x24e   : > { %3272 = vmatmul.msk.f32.gmra.mxu3 %vm265_vm1, %v3238_v32 }
 0x24f   : > { %3338 = vmatmul.msk.f32.gmra.mxu0 %vm265_vm1, %v3304_v26  ;;  %v2656_v38 = vadd.f32 %v4484_v27, %v2620_v15 }
 0x250   : > { %v1997_v44 = vpop.f32.mrf.mxu2 }
 0x251   : > { %v2688_v8 = vmax.f32 %v2656_v38, 0.0  ;;  %v2065_v60 = vadd.f32 %v1997_v44, %v1786_v22  ;;  %v2275_v30 = vpop.f32.mrf.mxu3  ;;  %v1721_v4 = vpop.f32.mrf.mxu1 }
 0x252   : > { %v1787_v33 = vadd.f32 %v1721_v4, %v4293_v10 }
 0x253   : > { %2720 = vst [vmem:[%s4498_s9 + $0x68] sm:$0xff] %v2688_v8  ;;  %v2343_v14 = vadd.f32 %v2275_v30, %v2065_v60 }
 0x254   : > { %v2556_v6 = vpop.f32.mrf.mxu0  ;;  %3141 = vmatmul.msk.f32.gmra.mxu1 %vm265_vm1, %v3303_v11 }
 0x255   : > { %v2621_v12 = vadd.f32 %v2553_v47, %v2343_v14  ;;  %3207 = vmatmul.msk.f32.gmra.mxu2 %vm265_vm1, %v3173_v46 }
 0x256   : > { %3273 = vmatmul.msk.f32.gmra.mxu3 %vm265_vm1, %v3239_v43 }
 0x257   : > { %3339 = vmatmul.msk.f32.gmra.mxu0 %vm265_vm1, %v3305_v40  ;;  %v2657_v45 = vadd.f32 %v4484_v27, %v2621_v12 }
 0x258   : > { %v2000_v7 = vpop.f32.mrf.mxu2 }
 0x259   : > { %v2689_v54 = vmax.f32 %v2657_v45, 0.0  ;;  %v2066_v1 = vadd.f32 %v2000_v7, %v1787_v33  ;;  %v2278_v3 = vpop.f32.mrf.mxu3  ;;  %v1724_v29 = vpop.f32.mrf.mxu1 }
 0x25a   : > { %v1788_v57 = vadd.f32 %v1724_v29, %v4304_v25 }
 0x25b   : > { %2721 = vst [vmem:[%s4498_s9 + $0x70] sm:$0xff] %v2689_v54  ;;  %v2344_v21 = vadd.f32 %v2278_v3, %v2066_v1 }
 0x25c   : > { %v2559_v36 = vpop.f32.mrf.mxu0 }
 0x25d   : > { %v2622_v61 = vadd.f32 %v2556_v6, %v2344_v21 }
 0x25f   : > { %v2658_v56 = vadd.f32 %v4484_v27, %v2622_v61 }
 0x260   : > { %v2003_v16 = vpop.f32.mrf.mxu2 }
 0x261   : > { %v2690_v55 = vmax.f32 %v2658_v56, 0.0  ;;  %v2067_v10 = vadd.f32 %v2003_v16, %v1788_v57  ;;  %v2281_v18 = vpop.f32.mrf.mxu3  ;;  %v1727_v31 = vpop.f32.mrf.mxu1 }
 0x262   : > { %v1789_v0 = vadd.f32 %v1727_v31, %v4315_v9 }
 0x263   : > { %2722 = vst [vmem:[%s4498_s9 + $0x78] sm:$0xff] %v2690_v55  ;;  %v2345_v59 = vadd.f32 %v2281_v18, %v2067_v10 }
 0x264   : > { %v2562_v11 = vpop.f32.mrf.mxu0 }
 0x265   : > { %v2623_v28 = vadd.f32 %v2559_v36, %v2345_v59 }
 0x267   : > { %v2659_v62 = vadd.f32 %v4484_v27, %v2623_v28 }
 0x268   : > { %v2006_v34 = vpop.f32.mrf.mxu2 }
 0x269   : > { %v2691_v13 = vmax.f32 %v2659_v62, 0.0  ;;  %v2068_v25 = vadd.f32 %v2006_v34, %v1789_v0  ;;  %v2284_v49 = vpop.f32.mrf.mxu3  ;;  %v1730_v50 = vpop.f32.mrf.mxu1 }
 0x26a   : > { %v1790_v63 = vadd.f32 %v1730_v50, %v4326_v42 }
 0x26b   : > { %2723 = vst [vmem:[%s4498_s9 + $0x80] sm:$0xff] %v2691_v13  ;;  %v2346_v5 = vadd.f32 %v2284_v49, %v2068_v25 }
 0x26c   : > { %v2565_v35 = vpop.f32.mrf.mxu0 }
 0x26d   : > { %v2624_v58 = vadd.f32 %v2562_v11, %v2346_v5 }
 0x26f   : > { %v2660_v32 = vadd.f32 %v4484_v27, %v2624_v58 }
 0x270   : > { %v2009_v47 = vpop.f32.mrf.mxu2 }
 0x271   : > { %v2692_v26 = vmax.f32 %v2660_v32, 0.0  ;;  %v2069_v9 = vadd.f32 %v2009_v47, %v1790_v63  ;;  %v2287_v15 = vpop.f32.mrf.mxu3  ;;  %v1733_v22 = vpop.f32.mrf.mxu1 }
 0x272   : > { %v1791_v60 = vadd.f32 %v1733_v22, %v4338_v53 }
 0x273   : > { %2724 = vst [vmem:[%s4498_s9 + $0x88] sm:$0xff] %v2692_v26  ;;  %v2347_v38 = vadd.f32 %v2287_v15, %v2069_v9 }
 0x274   : > { %v2568_v44 = vpop.f32.mrf.mxu0 }
 0x275   : > { %v2625_v8 = vadd.f32 %v2565_v35, %v2347_v38 }
 0x277   : > { %v2661_v30 = vadd.f32 %v4484_v27, %v2625_v8 }
 0x278   : > { %v2012_v4 = vpop.f32.mrf.mxu2 }
 0x279   : > { %v2693_v46 = vmax.f32 %v2661_v30, 0.0  ;;  %v2070_v42 = vadd.f32 %v2012_v4, %v1791_v60  ;;  %v2290_v14 = vpop.f32.mrf.mxu3  ;;  %v1736_v43 = vpop.f32.mrf.mxu1 }
 0x27a   : > { %v1792_v33 = vadd.f32 %v1736_v43, %v4349_v41 }
 0x27b   : > { %2725 = vst [vmem:[%s4498_s9 + $0x90] sm:$0xff] %v2693_v46  ;;  %v2348_v6 = vadd.f32 %v2290_v14, %v2070_v42 }
 0x27c   : > { %v2571_v40 = vpop.f32.mrf.mxu0 }
 0x27d   : > { %v2626_v12 = vadd.f32 %v2568_v44, %v2348_v6 }
 0x27f   : > { %v2662_v45 = vadd.f32 %v4484_v27, %v2626_v12 }
 0x280   : > { %v2015_v7 = vpop.f32.mrf.mxu2 }
 0x281   : > { %v2694_v54 = vmax.f32 %v2662_v45, 0.0  ;;  %v2071_v53 = vadd.f32 %v2015_v7, %v1792_v33  ;;  %v2293_v1 = vpop.f32.mrf.mxu3  ;;  %v1739_v3 = vpop.f32.mrf.mxu1 }
 0x282   : > { %v1793_v61 = vadd.f32 %v1739_v3, %v4360_v52 }
 0x283   : > { %2726 = vst [vmem:[%s4498_s9 + $0x98] sm:$0xff] %v2694_v54  ;;  %v2349_v29 = vadd.f32 %v2293_v1, %v2071_v53 }
 0x284   : > { %v2574_v21 = vpop.f32.mrf.mxu0 }
 0x285   : > { %v2627_v36 = vadd.f32 %v2571_v40, %v2349_v29 }
 0x287   : > { %v2663_v57 = vadd.f32 %v4484_v27, %v2627_v36 }
 0x288   : > { %v2018_v56 = vpop.f32.mrf.mxu2 }
 0x289   : > { %v2695_v16 = vmax.f32 %v2663_v57, 0.0  ;;  %v2072_v41 = vadd.f32 %v2018_v56, %v1793_v61  ;;  %v2296_v55 = vpop.f32.mrf.mxu3  ;;  %v1742_v10 = vpop.f32.mrf.mxu1 }
 0x28a   : > { %v1794_v11 = vadd.f32 %v1742_v10, %v4371_v48 }
 0x28b   : > { %2727 = vst [vmem:[%s4498_s9 + $0xa0] sm:$0xff] %v2695_v16  ;;  %v2350_v18 = vadd.f32 %v2296_v55, %v2072_v41 }
 0x28c   : > { %v2577_v31 = vpop.f32.mrf.mxu0 }
 0x28d   : > { %v2628_v59 = vadd.f32 %v2574_v21, %v2350_v18 }
 0x28f   : > { %v2664_v28 = vadd.f32 %v4484_v27, %v2628_v59 }
 0x290   : > { %v2021_v0 = vpop.f32.mrf.mxu2 }
 0x291   : > { %v2696_v62 = vmax.f32 %v2664_v28, 0.0  ;;  %v2073_v52 = vadd.f32 %v2021_v0, %v1794_v11  ;;  %v2299_v34 = vpop.f32.mrf.mxu3  ;;  %v1745_v13 = vpop.f32.mrf.mxu1 }
 0x292   : > { %v1795_v5 = vadd.f32 %v1745_v13, %v4382_v19 }
 0x293   : > { %2728 = vst [vmem:[%s4498_s9 + $0xa8] sm:$0xff] %v2696_v62  ;;  %v2351_v25 = vadd.f32 %v2299_v34, %v2073_v52 }
 0x294   : > { %v2580_v49 = vpop.f32.mrf.mxu0 }
 0x295   : > { %v2629_v50 = vadd.f32 %v2577_v31, %v2351_v25 }
 0x297   : > { %v2665_v35 = vadd.f32 %v4484_v27, %v2629_v50 }
 0x298   : > { %v2024_v58 = vpop.f32.mrf.mxu2 }
 0x299   : > { %v2697_v63 = vmax.f32 %v2665_v35, 0.0  ;;  %v2074_v48 = vadd.f32 %v2024_v58, %v1795_v5  ;;  %v2302_v32 = vpop.f32.mrf.mxu3  ;;  %v1748_v47 = vpop.f32.mrf.mxu1 }
 0x29a   : > { %v1796_v22 = vadd.f32 %v1748_v47, %v4393_v24 }
 0x29b   : > { %2729 = vst [vmem:[%s4498_s9 + $0xb0] sm:$0xff] %v2697_v63  ;;  %v2352_v26 = vadd.f32 %v2302_v32, %v2074_v48 }
 0x29c   : > { %v2583_v9 = vpop.f32.mrf.mxu0 }
 0x29d   : > { %v2630_v15 = vadd.f32 %v2580_v49, %v2352_v26 }
 0x29f   : > { %v2666_v38 = vadd.f32 %v4484_v27, %v2630_v15 }
 0x2a0   : > { %v2027_v44 = vpop.f32.mrf.mxu2 }
 0x2a1   : > { %v2698_v8 = vmax.f32 %v2666_v38, 0.0  ;;  %v2075_v19 = vadd.f32 %v2027_v44, %v1796_v22  ;;  %v2305_v60 = vpop.f32.mrf.mxu3  ;;  %v1751_v30 = vpop.f32.mrf.mxu1 }
 0x2a2   : > { %v1797_v14 = vadd.f32 %v1751_v30, %v4404_v20 }
 0x2a3   : > { %2730 = vst [vmem:[%s4498_s9 + $0xb8] sm:$0xff] %v2698_v8  ;;  %v2353_v4 = vadd.f32 %v2305_v60, %v2075_v19 }
 0x2a4   : > { %v2586_v46 = vpop.f32.mrf.mxu0 }
 0x2a5   : > { %v2631_v42 = vadd.f32 %v2583_v9, %v2353_v4 }
 0x2a7   : > { %v2667_v43 = vadd.f32 %v4484_v27, %v2631_v42 }
 0x2a8   : > { %v2030_v6 = vpop.f32.mrf.mxu2 }
 0x2a9   : > { %v2699_v40 = vmax.f32 %v2667_v43, 0.0  ;;  %v2076_v24 = vadd.f32 %v2030_v6, %v1797_v14  ;;  %v2308_v12 = vpop.f32.mrf.mxu3  ;;  %v1754_v33 = vpop.f32.mrf.mxu1 }
 0x2aa   : > { %v1798_v53 = vadd.f32 %v1754_v33, %v4415_v17 }
 0x2ab   : > { %2731 = vst [vmem:[%s4498_s9 + $0xc0] sm:$0xff] %v2699_v40  ;;  %v2354_v45 = vadd.f32 %v2308_v12, %v2076_v24 }
 0x2ac   : > { %v2589_v7 = vpop.f32.mrf.mxu0 }
 0x2ad   : > { %v2632_v54 = vadd.f32 %v2586_v46, %v2354_v45 }
 0x2af   : > { %v2668_v1 = vadd.f32 %v4484_v27, %v2632_v54 }
 0x2b0   : > { %v2033_v3 = vpop.f32.mrf.mxu2 }
 0x2b1   : > { %v2700_v29 = vmax.f32 %v2668_v1, 0.0  ;;  %v2077_v20 = vadd.f32 %v2033_v3, %v1798_v53  ;;  %v2311_v21 = vpop.f32.mrf.mxu3  ;;  %v1757_v36 = vpop.f32.mrf.mxu1 }
 0x2b2   : > { %v1799_v16 = vadd.f32 %v1757_v36, %v4426_v51 }
 0x2b3   : > { %2732 = vst [vmem:[%s4498_s9 + $0xc8] sm:$0xff] %v2700_v29  ;;  %v2355_v61 = vadd.f32 %v2311_v21, %v2077_v20 }
 0x2b4   : > { %v2592_v57 = vpop.f32.mrf.mxu0 }
 0x2b5   : > { %v2633_v56 = vadd.f32 %v2589_v7, %v2355_v61 }
 0x2b7   : > { %v2669_v41 = vadd.f32 %v4484_v27, %v2633_v56 }
 0x2b8   : > { %v2036_v55 = vpop.f32.mrf.mxu2 }
 0x2b9   : > { %v2701_v10 = vmax.f32 %v2669_v41, 0.0  ;;  %v2078_v17 = vadd.f32 %v2036_v55, %v1799_v16  ;;  %v2314_v18 = vpop.f32.mrf.mxu3  ;;  %v1760_v31 = vpop.f32.mrf.mxu1 }
 0x2ba   : > { %v1800_v0 = vadd.f32 %v1760_v31, %v4437_v39 }
 0x2bb   : > { %2733 = vst [vmem:[%s4498_s9 + $0xd0] sm:$0xff] %v2701_v10  ;;  %v2356_v59 = vadd.f32 %v2314_v18, %v2078_v17 }
 0x2bc   : > { %v2595_v11 = vpop.f32.mrf.mxu0 }
 0x2bd   : > { %v2634_v28 = vadd.f32 %v2592_v57, %v2356_v59 }
 0x2bf   : > { %v2670_v62 = vadd.f32 %v4484_v27, %v2634_v28 }
 0x2c0   : > { %v2039_v52 = vpop.f32.mrf.mxu2 }
 0x2c1   : > { %v2702_v34 = vmax.f32 %v2670_v62, 0.0  ;;  %v2079_v51 = vadd.f32 %v2039_v52, %v1800_v0  ;;  %v2317_v13 = vpop.f32.mrf.mxu3  ;;  %v1763_v25 = vpop.f32.mrf.mxu1 }
 0x2c2   : > { %v1801_v35 = vadd.f32 %v1763_v25, %v4448_v37 }
 0x2c3   : > { %2734 = vst [vmem:[%s4498_s9 + $0xd8] sm:$0xff] %v2702_v34  ;;  %v2357_v49 = vadd.f32 %v2317_v13, %v2079_v51 }
 0x2c4   : > { %v2598_v5 = vpop.f32.mrf.mxu0 }
 0x2c5   : > { %v2635_v50 = vadd.f32 %v2595_v11, %v2357_v49 }
 0x2c7   : > { %v2671_v58 = vadd.f32 %v4484_v27, %v2635_v50 }
 0x2c8   : > { %v2042_v63 = vpop.f32.mrf.mxu2 }
 0x2c9   : > { %v2703_v48 = vmax.f32 %v2671_v58, 0.0  ;;  %v2080_v39 = vadd.f32 %v2042_v63, %v1801_v35  ;;  %v2320_v32 = vpop.f32.mrf.mxu3  ;;  %v1766_v47 = vpop.f32.mrf.mxu1 }
 0x2ca   : > { %v1802_v15 = vadd.f32 %v1766_v47, %v4459_v23 }
 0x2cb   : > { %2735 = vst [vmem:[%s4498_s9 + $0xe0] sm:$0xff] %v2703_v48  ;;  %v2358_v26 = vadd.f32 %v2320_v32, %v2080_v39 }
 0x2cc   : > { %v2601_v44 = vpop.f32.mrf.mxu0 }
 0x2cd   : > { %v2636_v9 = vadd.f32 %v2598_v5, %v2358_v26 }
 0x2cf   : > { %v2672_v22 = vadd.f32 %v4484_v27, %v2636_v9 }
 0x2d0   : > { %v2045_v38 = vpop.f32.mrf.mxu2 }
 0x2d1   : > { %v2704_v8 = vmax.f32 %v2672_v22, 0.0  ;;  %v2081_v37 = vadd.f32 %v2045_v38, %v1802_v15  ;;  %v2323_v19 = vpop.f32.mrf.mxu3  ;;  %v1769_v30 = vpop.f32.mrf.mxu1 }
 0x2d2   : > { %v1803_v46 = vadd.f32 %v1769_v30, %v4470_v2 }
 0x2d3   : > { %2736 = vst [vmem:[%s4498_s9 + $0xe8] sm:$0xff] %v2704_v8  ;;  %v2359_v60 = vadd.f32 %v2323_v19, %v2081_v37 }
 0x2d4   : > { %v2604_v40 = vpop.f32.mrf.mxu0 }
 0x2d5   : > { %v2637_v4 = vadd.f32 %v2601_v44, %v2359_v60 }
 0x2d7   : > { %v2673_v42 = vadd.f32 %v4484_v27, %v2637_v4 }
 0x2d8   : > { %v2048_v23 = vpop.f32.mrf.mxu2 }
 0x2d9   : > { %v2705_v14 = vmax.f32 %v2673_v42, 0.0  ;;  %v2082_v43 = vadd.f32 %v2048_v23, %v1803_v46  ;;  %v2326_v6 = vpop.f32.mrf.mxu3 }
 0x2db   : > { %2737 = vst [vmem:[%s4498_s9 + $0xf0] sm:$0xff] %v2705_v14  ;;  %v2360_v24 = vadd.f32 %v2326_v6, %v2082_v43 }
 0x2dd   : > { %v2638_v12 = vadd.f32 %v2604_v40, %v2360_v24 }
 0x2df   : > { %v2674_v2 = vadd.f32 %v4484_v27, %v2638_v12 }
 0x2e1   : > { %v2706_v33 = vmax.f32 %v2674_v2, 0.0 }
 0x2e3   : > { %2738 = vst [vmem:[%s4498_s9 + $0xf8] sm:$0xff] %v2706_v33 }
 0x2e4   : > { %3435 = shalt.err (!%p3432_p5)
}
 0x2e5   : > { %s3488_s5 = smov 128   ;;  %s3489_s7 = smov 8  }
 0x2e6   : > { %3350 = dma.vmem_to_hbm [thread:$0]  (%p3550_p4), %s2754_s21, 4096, %s2756_s23, %s2740_s15, %s3488_s5, %s3488_s5, %s3489_s7  }
 0x2e7 PF: > { %p3356_p6 = scmp.ge.s32.totalorder %s3486_s17, 2  ;;  %s2770_s8 = sand.u32 1, %s3466_s12  }
 0x2e8   : > { %s2771_s9 = scalar_lea.sflag [#allocation3], %s2770_s8 }
 0x2e9   : > { %p3353_p7 = pnand %p3356_p6, %p3557_p8 }
 0x2eb   : > { %p3354_p9 = pneg %p3353_p7 }
 0x2ed   : > { %3461 = dma.done.wait (%p3354_p9), %s2771_s9, 4096  }
 0x2ee   : > { %3463 = vsyncadd (%p3354_p9), %s2771_s9, 4294963200  ;;  %s16_s17 = sadd.s32 1, %s3486_s17   ;;  %s4859_s12 = smov %s3470_s13 }
 0x2ef   : > { %p13_p10 = scmp.ge.s32.totalorder %s16_s17, 4   ;;  %s4860_s13 = smov %s3474_s14 }
 0x2f0   : > { %s4861_s14 = smov %s3563_s25  ;;  %s4862_s15 = smov %s3482_s16 }
 0x2f1   : > { %s4863_s16 = smov %s4865_s20  ;;  %15 = sbr.rel (!%p13_p10) target bundleno = 4 (0x4), region = 77 }
 0x2f6   :  { %2777 = vsyncpa [#allocation3], 1 }
 0x2f7   :  { %2779 = vsyncpa [#allocation3 + $0x1], 1 }

</bundles_post_ra>
